<compile_context>
chip_gen: v7x
topology: tpu7x:2x2x1
jax: 0.10.0
libtpu: 0.0.40
codegen_flags: <defaults>
</compile_context>

<pallas_src>
import math
from functools import partial

import jax
import jax.numpy as jnp
from jax import lax
from jax.experimental import pallas as pl
from jax.experimental.pallas import tpu as pltpu


def encoder_kernel(xcat_ref, wbig_ref, bx_ref, whh_ref, bhn_ref,
                   wfc_ref, bfc_ref,
                   out_ref, hid_ref,
                   gxs_ref,
                   *, enc_hid_dim):
    H = enc_hid_dim
    L, B, E2 = xcat_ref.shape

    # ---- fused input projection (bf16 MXU, f32 accum), chunked over L ------
    # xcat[t] = [src[t] | src[L-1-t]]; wbig routes the first half to the fwd
    # gate columns and the second half to the bwd gate columns, so each scratch
    # row t already holds [r_f(t) r_b(L-1-t) | z_f z_b | n_f n_b].
    wbig = wbig_ref[...]
    bx = bx_ref[...]
    LCHUNK = min(L, 64)
    n_chunks = -(-L // LCHUNK)
    for c in range(n_chunks):                     # static starts; tail overlaps (idempotent)
        s = min(c * LCHUNK, L - LCHUNK)
        x = xcat_ref[pl.ds(s, LCHUNK)].reshape(LCHUNK * B, E2)
        g = jnp.dot(x, wbig, preferred_element_type=jnp.float32) + bx
        gxs_ref[pl.ds(s, LCHUNK)] = g.reshape(LCHUNK, B, 6 * H).astype(gxs_ref.dtype)

    whh = whh_ref[...]                 # (2H, 6H) bf16 block-diag, gate-major
    bhn = bhn_ref[...]                 # (1, 2H)  [b_hn_f | b_hn_b], f32

    # PyTorch GRU cell, gate order [r, z, n] (b_hr / b_hz pre-folded into gx):
    #   r  = sigmoid(gx_r + W_hr h)
    #   z  = sigmoid(gx_z + W_hz h)
    #   n  = tanh   (gx_n + r * (W_hn h + b_hn))
    #   h' = n + z * (h - n)
    # Single (B, 2H) carry [h_f | h_b]; fwd consumes src[0..t], bwd consumes
    # src[L-1..L-1-t] (its gx rows were time-reversed at projection time).
    def step(t, h):
        gx = gxs_ref[t].astype(jnp.float32)                        # (B, 6H)
        gh = jnp.dot(h.astype(jnp.bfloat16), whh,
                     preferred_element_type=jnp.float32)           # (B, 6H)
        rz = jax.nn.sigmoid(gx[:, :4 * H] + gh[:, :4 * H])
        r = rz[:, :2 * H]
        z = rz[:, 2 * H:]
        n = jnp.tanh(gx[:, 4 * H:] + r * (gh[:, 4 * H:] + bhn))
        h = n + z * (h - n)
        out_ref[pl.ds(t, 1), :, :] = h.astype(out_ref.dtype)[jnp.newaxis]
        return h

    h0 = jnp.zeros((B, 2 * H), jnp.float32)
    unroll = True if L <= 32 else 8
    h = lax.fori_loop(0, L, step, h0, unroll=unroll)

    # ---- hidden = tanh(fc(cat(h_fwd_final, h_bwd_final))) ------------------
    # h is already [h_f_final | h_b_final]; wfc rows are ordered to match.
    hid_ref[...] = jnp.tanh(
        jnp.dot(h, wfc_ref[...], preferred_element_type=jnp.float32)
        + bfc_ref[...])


def _fuse_params(params, emb_dim, enc_hid_dim):
    """Build the fused / reordered weights the kernel expects (pure XLA)."""
    H = enc_hid_dim
    E = emb_dim

    def gates(w):      # (3H, X) -> (r, z, n), each (H, X)
        return w[:H], w[H:2 * H], w[2 * H:]

    # Input projection (2E, 6H): rows 0:E act on src[t] (forward), rows E:2E on
    # src[L-1-t] (backward); columns gate-major interleaved.
    r_f, z_f, n_f = gates(params["wih_f"])
    r_b, z_b, n_b = gates(params["wih_b"])
    wbig = jnp.zeros((2 * E, 6 * H), jnp.float32)
    wbig = wbig.at[:E, 0 * H:1 * H].set(r_f.T)
    wbig = wbig.at[:E, 2 * H:3 * H].set(z_f.T)
    wbig = wbig.at[:E, 4 * H:5 * H].set(n_f.T)
    wbig = wbig.at[E:, 1 * H:2 * H].set(r_b.T)
    wbig = wbig.at[E:, 3 * H:4 * H].set(z_b.T)
    wbig = wbig.at[E:, 5 * H:6 * H].set(n_b.T)

    # Block-diagonal recurrent weight (2H, 6H) for the carry [h_f | h_b],
    # same gate-major interleaved column order.
    hr_f, hz_f, hn_f = gates(params["whh_f"])
    hr_b, hz_b, hn_b = gates(params["whh_b"])
    whh = jnp.zeros((2 * H, 6 * H), jnp.float32)
    whh = whh.at[:H, 0 * H:1 * H].set(hr_f.T)
    whh = whh.at[:H, 2 * H:3 * H].set(hz_f.T)
    whh = whh.at[:H, 4 * H:5 * H].set(hn_f.T)
    whh = whh.at[H:, 1 * H:2 * H].set(hr_b.T)
    whh = whh.at[H:, 3 * H:4 * H].set(hz_b.T)
    whh = whh.at[H:, 5 * H:6 * H].set(hn_b.T)

    bi_f, bh_f = params["bih_f"], params["bhh_f"]
    bi_b, bh_b = params["bih_b"], params["bhh_b"]
    # Fold b_hr / b_hz into the input bias; b_hn stays in the recurrent term.
    bx = jnp.concatenate([
        bi_f[:H] + bh_f[:H],             # r_f
        bi_b[:H] + bh_b[:H],             # r_b
        bi_f[H:2 * H] + bh_f[H:2 * H],   # z_f
        bi_b[H:2 * H] + bh_b[H:2 * H],   # z_b
        bi_f[2 * H:],                    # n_f
        bi_b[2 * H:],                    # n_b
    ])[None]                             # (1, 6H)
    bhn = jnp.concatenate([bh_f[2 * H:], bh_b[2 * H:]])[None]    # (1, 2H)

    wfc = params["wfc"].T                # (2H, D) — rows already [h_f | h_b]
    bfc = params["bfc"][None]            # (1, D)
    return wbig, whh, bx, bhn, wfc, bfc


def encoder_forward(src, params, *, enc_hid_dim, dec_hid_dim):
    """src: (src_len, batch, emb_dim) float32. Returns (outputs, hidden)."""
    L, B, E = src.shape
    H = enc_hid_dim

    wbig, whh, bx, bhn, wfc, bfc = _fuse_params(params, E, H)

    # xcat[t] = [src[t] | src[L-1-t]]: one bf16 MXU matmul then produces the
    # forward and (time-reversed) backward gate activations in a single slab.
    xcat = jnp.concatenate([src, src[::-1]], axis=-1).astype(jnp.bfloat16)

    args = (
        xcat,
        wbig.astype(jnp.bfloat16),
        bx,
        whh.astype(jnp.bfloat16),        # bf16 recurrent matmul on the serial chain
        bhn, wfc, bfc,
    )

    def full_spec(a):
        nd = a.ndim
        return pl.BlockSpec(a.shape, lambda i, _n=nd: (0,) * _n)

    out_shape = (
        jax.ShapeDtypeStruct((L, B, 2 * H), jnp.bfloat16),        # [h_f(t) | h_b(L-1-t)]
        jax.ShapeDtypeStruct((B, dec_hid_dim), jnp.float32),      # hidden
    )
    out_specs = (
        pl.BlockSpec((L, B, 2 * H), lambda i: (0, 0, 0)),
        pl.BlockSpec((B, dec_hid_dim), lambda i: (0, 0)),
    )

    kernel = partial(encoder_kernel, enc_hid_dim=H)
    out_comb, hidden = pl.pallas_call(
        kernel,
        out_shape=out_shape,
        grid=(1,),
        in_specs=[full_spec(a) for a in args],
        out_specs=out_specs,
        scratch_shapes=[pltpu.VMEM((L, B, 6 * H), jnp.bfloat16)],  # gate activations
        compiler_params=pltpu.CompilerParams(
            dimension_semantics=("arbitrary",),
            vmem_limit_bytes=48 * 1024 * 1024),
    )(*args)

    # Un-reverse the backward half and assemble (L, B, 2H) outputs in XLA.
    out_comb = out_comb.astype(jnp.float32)
    outputs = jnp.concatenate([out_comb[:, :, :H], out_comb[::-1, :, H:]], axis=-1)
    return outputs, hidden


def encoder_reference(src, params, *, enc_hid_dim, dec_hid_dim):
    """Pure-JAX f32 reference mirroring PyTorch bidirectional GRU + fc + tanh."""
    H = enc_hid_dim
    L, B, E = src.shape

    def cell(x, h, wih, whh, bih, bhh):
        gx = x @ wih.T + bih
        gh = h @ whh.T + bhh
        r = jax.nn.sigmoid(gx[:, :H] + gh[:, :H])
        z = jax.nn.sigmoid(gx[:, H:2 * H] + gh[:, H:2 * H])
        n = jnp.tanh(gx[:, 2 * H:] + r * gh[:, 2 * H:])
        return (1.0 - z) * n + z * h

    h_f = jnp.zeros((B, H), jnp.float32)
    h_b = jnp.zeros((B, H), jnp.float32)
    out_f = [None] * L
    out_b = [None] * L
    for t in range(L):
        h_f = cell(src[t], h_f, params["wih_f"], params["whh_f"],
                   params["bih_f"], params["bhh_f"])
        out_f[t] = h_f
    for t in reversed(range(L)):
        h_b = cell(src[t], h_b, params["wih_b"], params["whh_b"],
                   params["bih_b"], params["bhh_b"])
        out_b[t] = h_b
    outputs = jnp.concatenate([jnp.stack(out_f), jnp.stack(out_b)], axis=-1)
    cat = jnp.concatenate([h_f, h_b], axis=1)
    hidden = jnp.tanh(cat @ params["wfc"].T + params["bfc"])
    return outputs, hidden


def init_params(key, emb_dim, enc_hid_dim, dec_hid_dim):
    """Deterministic synthetic init mirroring nn.GRU / nn.Linear shapes."""
    H = enc_hid_dim
    k_gru = 1.0 / math.sqrt(H)
    k_fc = 1.0 / math.sqrt(2 * H)
    keys = jax.random.split(key, 10)
    u = lambda k, shape, b: jax.random.uniform(k, shape, jnp.float32, -b, b)
    return {
        "wih_f": u(keys[0], (3 * H, emb_dim), k_gru),
        "whh_f": u(keys[1], (3 * H, H), k_gru),
        "bih_f": u(keys[2], (3 * H,), k_gru),
        "bhh_f": u(keys[3], (3 * H,), k_gru),
        "wih_b": u(keys[4], (3 * H, emb_dim), k_gru),
        "whh_b": u(keys[5], (3 * H, H), k_gru),
        "bih_b": u(keys[6], (3 * H,), k_gru),
        "bhh_b": u(keys[7], (3 * H,), k_gru),
        "wfc": u(keys[8], (dec_hid_dim, 2 * H), k_fc),
        "bfc": u(keys[9], (dec_hid_dim,), k_fc),
    }


if __name__ == "__main__":
    # Small shapes consistent with the module's forward contract.
    src_len, batch = 8, 2
    emb_dim, enc_hid_dim, dec_hid_dim = 32, 32, 32

    key = jax.random.PRNGKey(0)
    k_src, k_par = jax.random.split(key)
    src = jax.random.normal(k_src, (src_len, batch, emb_dim), jnp.float32)
    params = init_params(k_par, emb_dim, enc_hid_dim, dec_hid_dim)

    outputs, hidden = encoder_forward(
        src, params, enc_hid_dim=enc_hid_dim, dec_hid_dim=dec_hid_dim)
    jax.block_until_ready((outputs, hidden))

    assert outputs.shape == (src_len, batch, 2 * enc_hid_dim)
    assert hidden.shape == (batch, dec_hid_dim)

    # Numerical check vs. pure-JAX f32 reference (kernel uses bf16 input
    # projection, bf16 recurrent matmul and bf16 activation/output storage,
    # so tolerance is loose).
    ref_out, ref_hid = encoder_reference(
        src, params, enc_hid_dim=enc_hid_dim, dec_hid_dim=dec_hid_dim)
    assert float(jnp.max(jnp.abs(outputs - ref_out))) < 5e-2
    assert float(jnp.max(jnp.abs(hidden - ref_hid))) < 5e-2

    print("KERNEL_OK")
</pallas_src>

<mosaic_0001>
module attributes {stable_mosaic.version = 11 : i64} {
  func.func @encoder_kernel(%arg0: i32, %arg1: memref<8x2x64xbf16, #tpu.memory_space<vmem>>, %arg2: memref<64x192xbf16, #tpu.memory_space<vmem>>, %arg3: memref<1x192xf32, #tpu.memory_space<vmem>>, %arg4: memref<64x192xbf16, #tpu.memory_space<vmem>>, %arg5: memref<1x64xf32, #tpu.memory_space<vmem>>, %arg6: memref<64x32xf32, #tpu.memory_space<vmem>>, %arg7: memref<1x32xf32, #tpu.memory_space<vmem>>, %arg8: memref<8x2x64xbf16, #tpu.memory_space<vmem>>, %arg9: memref<2x32xf32, #tpu.memory_space<vmem>>, %arg10: memref<8x2x192xbf16, #tpu.memory_space<vmem>>) attributes {dimension_semantics = [#tpu.dimension_semantics<arbitrary>], iteration_bounds = array<i64: 1>, scalar_prefetch = 0 : i64, scratch_operands = 1 : i64, tpu.core_type = #tpu.core_type<tc>, window_params = [{pipeline_mode = #tpu.pipeline_mode<synchronous>, transform_indices = @transform_0, window_bounds = array<i64: 8, 2, 64>}, {pipeline_mode = #tpu.pipeline_mode<synchronous>, transform_indices = @transform_1, window_bounds = array<i64: 64, 192>}, {pipeline_mode = #tpu.pipeline_mode<synchronous>, transform_indices = @transform_2, window_bounds = array<i64: 1, 192>}, {pipeline_mode = #tpu.pipeline_mode<synchronous>, transform_indices = @transform_3, window_bounds = array<i64: 64, 192>}, {pipeline_mode = #tpu.pipeline_mode<synchronous>, transform_indices = @transform_4, window_bounds = array<i64: 1, 64>}, {pipeline_mode = #tpu.pipeline_mode<synchronous>, transform_indices = @transform_5, window_bounds = array<i64: 64, 32>}, {pipeline_mode = #tpu.pipeline_mode<synchronous>, transform_indices = @transform_6, window_bounds = array<i64: 1, 32>}, {pipeline_mode = #tpu.pipeline_mode<synchronous>, transform_indices = @transform_7, window_bounds = array<i64: 8, 2, 64>}, {pipeline_mode = #tpu.pipeline_mode<synchronous>, transform_indices = @transform_8, window_bounds = array<i64: 2, 32>}]} {
    %c0 = arith.constant 0 : index
    %c0_0 = arith.constant 0 : index
    %0 = vector.load %arg2[%c0, %c0_0] : memref<64x192xbf16, #tpu.memory_space<vmem>>, vector<64x192xbf16>
    %c0_1 = arith.constant 0 : index
    %c0_2 = arith.constant 0 : index
    %1 = vector.load %arg3[%c0_1, %c0_2] : memref<1x192xf32, #tpu.memory_space<vmem>>, vector<1x192xf32>
    %c0_3 = arith.constant 0 : index
    %c0_4 = arith.constant 0 : index
    %c0_5 = arith.constant 0 : index
    %2 = vector.load %arg1[%c0_3, %c0_4, %c0_5] : memref<8x2x64xbf16, #tpu.memory_space<vmem>>, vector<8x2x64xbf16>
    %3 = vector.shape_cast %2 : vector<8x2x64xbf16> to vector<16x64xbf16>
    %cst = arith.constant dense<0.000000e+00> : vector<16x192xf32>
    %4 = tpu.matmul %3, %0, %cst {dimension_numbers = #tpu.dot_dimension_numbers<[1], [0], [0], [1], [0, 0, 1, 1], [], []>} : vector<16x64xbf16>, vector<64x192xbf16>, vector<16x192xf32> -> vector<16x192xf32>
    %5 = vector.broadcast %1 : vector<1x192xf32> to vector<16x192xf32>
    %6 = arith.addf %4, %5 : vector<16x192xf32>
    %7 = vector.shape_cast %6 : vector<16x192xf32> to vector<8x2x192xf32>
    %8 = arith.truncf %7 : vector<8x2x192xf32> to vector<8x2x192xbf16>
    %c0_6 = arith.constant 0 : index
    %c0_7 = arith.constant 0 : index
    %c0_8 = arith.constant 0 : index
    %9 = vector.load %arg10[%c0_6, %c0_7, %c0_8] : memref<8x2x192xbf16, #tpu.memory_space<vmem>>, vector<8x2x192xbf16>
    tpu.vector_store %arg10[%c0_6, %c0_7, %c0_8], %8 {strides = array<i32>} : memref<8x2x192xbf16, #tpu.memory_space<vmem>>, vector<8x2x192xbf16>,
    %c0_9 = arith.constant 0 : index
    %c0_10 = arith.constant 0 : index
    %10 = vector.load %arg4[%c0_9, %c0_10] : memref<64x192xbf16, #tpu.memory_space<vmem>>, vector<64x192xbf16>
    %c0_11 = arith.constant 0 : index
    %c0_12 = arith.constant 0 : index
    %11 = vector.load %arg5[%c0_11, %c0_12] : memref<1x64xf32, #tpu.memory_space<vmem>>, vector<1x64xf32>
    %cst_13 = arith.constant 0.000000e+00 : f32
    %12 = vector.broadcast %cst_13 : f32 to vector<2x64xf32>
    %c0_i32 = arith.constant 0 : i32
    %13 = arith.index_cast %c0_i32 : i32 to index
    %c0_14 = arith.constant 0 : index
    %c0_15 = arith.constant 0 : index
    %14 = vector.load %arg10[%13, %c0_14, %c0_15] : memref<8x2x192xbf16, #tpu.memory_space<vmem>>, vector<1x2x192xbf16>
    %15 = vector.shape_cast %14 : vector<1x2x192xbf16> to vector<2x192xbf16>
    %16 = arith.extf %15 : vector<2x192xbf16> to vector<2x192xf32>
    %17 = arith.truncf %12 : vector<2x64xf32> to vector<2x64xbf16>
    %cst_16 = arith.constant dense<0.000000e+00> : vector<2x192xf32>
    %18 = tpu.matmul %17, %10, %cst_16 {dimension_numbers = #tpu.dot_dimension_numbers<[1], [0], [0], [1], [0, 0, 1, 1], [], []>} : vector<2x64xbf16>, vector<64x192xbf16>, vector<2x192xf32> -> vector<2x192xf32>
    %19 = vector.extract_strided_slice %16 {offsets = [0, 0], sizes = [2, 128], strides = [1, 1]} : vector<2x192xf32> to vector<2x128xf32>
    %20 = vector.extract_strided_slice %18 {offsets = [0, 0], sizes = [2, 128], strides = [1, 1]} : vector<2x192xf32> to vector<2x128xf32>
    %21 = arith.addf %19, %20 : vector<2x128xf32>
    %22 = arith.negf %21 : vector<2x128xf32>
    %23 = math.exp %22 : vector<2x128xf32>
    %cst_17 = arith.constant 1.000000e+00 : f32
    %24 = vector.broadcast %cst_17 : f32 to vector<2x128xf32>
    %25 = arith.addf %24, %23 : vector<2x128xf32>
    %26 = arith.divf %24, %25 : vector<2x128xf32>
    %27 = vector.extract_strided_slice %26 {offsets = [0, 0], sizes = [2, 64], strides = [1, 1]} : vector<2x128xf32> to vector<2x64xf32>
    %28 = vector.extract_strided_slice %26 {offsets = [0, 64], sizes = [2, 64], strides = [1, 1]} : vector<2x128xf32> to vector<2x64xf32>
    %29 = vector.extract_strided_slice %16 {offsets = [0, 128], sizes = [2, 64], strides = [1, 1]} : vector<2x192xf32> to vector<2x64xf32>
    %30 = vector.extract_strided_slice %18 {offsets = [0, 128], sizes = [2, 64], strides = [1, 1]} : vector<2x192xf32> to vector<2x64xf32>
    %31 = vector.broadcast %11 : vector<1x64xf32> to vector<2x64xf32>
    %32 = arith.addf %30, %31 : vector<2x64xf32>
    %33 = arith.mulf %27, %32 : vector<2x64xf32>
    %34 = arith.addf %29, %33 : vector<2x64xf32>
    %35 = math.tanh %34 : vector<2x64xf32>
    %36 = arith.subf %12, %35 : vector<2x64xf32>
    %37 = arith.mulf %28, %36 : vector<2x64xf32>
    %38 = arith.addf %35, %37 : vector<2x64xf32>
    %39 = arith.truncf %38 : vector<2x64xf32> to vector<2x64xbf16>
    %40 = vector.shape_cast %39 : vector<2x64xbf16> to vector<1x2x64xbf16>
    %41 = arith.index_cast %c0_i32 : i32 to index
    %c0_18 = arith.constant 0 : index
    %c0_19 = arith.constant 0 : index
    %42 = vector.load %arg8[%41, %c0_18, %c0_19] : memref<8x2x64xbf16, #tpu.memory_space<vmem>>, vector<1x2x64xbf16>
    tpu.vector_store %arg8[%41, %c0_18, %c0_19], %40 {strides = array<i32>} : memref<8x2x64xbf16, #tpu.memory_space<vmem>>, vector<1x2x64xbf16>,
    %c1_i32 = arith.constant 1 : i32
    %43 = arith.index_cast %c1_i32 : i32 to index
    %c0_20 = arith.constant 0 : index
    %c0_21 = arith.constant 0 : index
    %44 = vector.load %arg10[%43, %c0_20, %c0_21] : memref<8x2x192xbf16, #tpu.memory_space<vmem>>, vector<1x2x192xbf16>
    %45 = vector.shape_cast %44 : vector<1x2x192xbf16> to vector<2x192xbf16>
    %46 = arith.extf %45 : vector<2x192xbf16> to vector<2x192xf32>
    %47 = arith.truncf %38 : vector<2x64xf32> to vector<2x64xbf16>
    %cst_22 = arith.constant dense<0.000000e+00> : vector<2x192xf32>
    %48 = tpu.matmul %47, %10, %cst_22 {dimension_numbers = #tpu.dot_dimension_numbers<[1], [0], [0], [1], [0, 0, 1, 1], [], []>} : vector<2x64xbf16>, vector<64x192xbf16>, vector<2x192xf32> -> vector<2x192xf32>
    %49 = vector.extract_strided_slice %46 {offsets = [0, 0], sizes = [2, 128], strides = [1, 1]} : vector<2x192xf32> to vector<2x128xf32>
    %50 = vector.extract_strided_slice %48 {offsets = [0, 0], sizes = [2, 128], strides = [1, 1]} : vector<2x192xf32> to vector<2x128xf32>
    %51 = arith.addf %49, %50 : vector<2x128xf32>
    %52 = arith.negf %51 : vector<2x128xf32>
    %53 = math.exp %52 : vector<2x128xf32>
    %cst_23 = arith.constant 1.000000e+00 : f32
    %54 = vector.broadcast %cst_23 : f32 to vector<2x128xf32>
    %55 = arith.addf %54, %53 : vector<2x128xf32>
    %56 = arith.divf %54, %55 : vector<2x128xf32>
    %57 = vector.extract_strided_slice %56 {offsets = [0, 0], sizes = [2, 64], strides = [1, 1]} : vector<2x128xf32> to vector<2x64xf32>
    %58 = vector.extract_strided_slice %56 {offsets = [0, 64], sizes = [2, 64], strides = [1, 1]} : vector<2x128xf32> to vector<2x64xf32>
    %59 = vector.extract_strided_slice %46 {offsets = [0, 128], sizes = [2, 64], strides = [1, 1]} : vector<2x192xf32> to vector<2x64xf32>
    %60 = vector.extract_strided_slice %48 {offsets = [0, 128], sizes = [2, 64], strides = [1, 1]} : vector<2x192xf32> to vector<2x64xf32>
    %61 = vector.broadcast %11 : vector<1x64xf32> to vector<2x64xf32>
    %62 = arith.addf %60, %61 : vector<2x64xf32>
    %63 = arith.mulf %57, %62 : vector<2x64xf32>
    %64 = arith.addf %59, %63 : vector<2x64xf32>
    %65 = math.tanh %64 : vector<2x64xf32>
    %66 = arith.subf %38, %65 : vector<2x64xf32>
    %67 = arith.mulf %58, %66 : vector<2x64xf32>
    %68 = arith.addf %65, %67 : vector<2x64xf32>
    %69 = arith.truncf %68 : vector<2x64xf32> to vector<2x64xbf16>
    %70 = vector.shape_cast %69 : vector<2x64xbf16> to vector<1x2x64xbf16>
    %71 = arith.index_cast %c1_i32 : i32 to index
    %c0_24 = arith.constant 0 : index
    %c0_25 = arith.constant 0 : index
    %72 = vector.load %arg8[%71, %c0_24, %c0_25] : memref<8x2x64xbf16, #tpu.memory_space<vmem>>, vector<1x2x64xbf16>
    tpu.vector_store %arg8[%71, %c0_24, %c0_25], %70 {strides = array<i32>} : memref<8x2x64xbf16, #tpu.memory_space<vmem>>, vector<1x2x64xbf16>,
    %c2_i32 = arith.constant 2 : i32
    %73 = arith.index_cast %c2_i32 : i32 to index
    %c0_26 = arith.constant 0 : index
    %c0_27 = arith.constant 0 : index
    %74 = vector.load %arg10[%73, %c0_26, %c0_27] : memref<8x2x192xbf16, #tpu.memory_space<vmem>>, vector<1x2x192xbf16>
    %75 = vector.shape_cast %74 : vector<1x2x192xbf16> to vector<2x192xbf16>
    %76 = arith.extf %75 : vector<2x192xbf16> to vector<2x192xf32>
    %77 = arith.truncf %68 : vector<2x64xf32> to vector<2x64xbf16>
    %cst_28 = arith.constant dense<0.000000e+00> : vector<2x192xf32>
    %78 = tpu.matmul %77, %10, %cst_28 {dimension_numbers = #tpu.dot_dimension_numbers<[1], [0], [0], [1], [0, 0, 1, 1], [], []>} : vector<2x64xbf16>, vector<64x192xbf16>, vector<2x192xf32> -> vector<2x192xf32>
    %79 = vector.extract_strided_slice %76 {offsets = [0, 0], sizes = [2, 128], strides = [1, 1]} : vector<2x192xf32> to vector<2x128xf32>
    %80 = vector.extract_strided_slice %78 {offsets = [0, 0], sizes = [2, 128], strides = [1, 1]} : vector<2x192xf32> to vector<2x128xf32>
    %81 = arith.addf %79, %80 : vector<2x128xf32>
    %82 = arith.negf %81 : vector<2x128xf32>
    %83 = math.exp %82 : vector<2x128xf32>
    %cst_29 = arith.constant 1.000000e+00 : f32
    %84 = vector.broadcast %cst_29 : f32 to vector<2x128xf32>
    %85 = arith.addf %84, %83 : vector<2x128xf32>
    %86 = arith.divf %84, %85 : vector<2x128xf32>
    %87 = vector.extract_strided_slice %86 {offsets = [0, 0], sizes = [2, 64], strides = [1, 1]} : vector<2x128xf32> to vector<2x64xf32>
    %88 = vector.extract_strided_slice %86 {offsets = [0, 64], sizes = [2, 64], strides = [1, 1]} : vector<2x128xf32> to vector<2x64xf32>
    %89 = vector.extract_strided_slice %76 {offsets = [0, 128], sizes = [2, 64], strides = [1, 1]} : vector<2x192xf32> to vector<2x64xf32>
    %90 = vector.extract_strided_slice %78 {offsets = [0, 128], sizes = [2, 64], strides = [1, 1]} : vector<2x192xf32> to vector<2x64xf32>
    %91 = vector.broadcast %11 : vector<1x64xf32> to vector<2x64xf32>
    %92 = arith.addf %90, %91 : vector<2x64xf32>
    %93 = arith.mulf %87, %92 : vector<2x64xf32>
    %94 = arith.addf %89, %93 : vector<2x64xf32>
    %95 = math.tanh %94 : vector<2x64xf32>
    %96 = arith.subf %68, %95 : vector<2x64xf32>
    %97 = arith.mulf %88, %96 : vector<2x64xf32>
    %98 = arith.addf %95, %97 : vector<2x64xf32>
    %99 = arith.truncf %98 : vector<2x64xf32> to vector<2x64xbf16>
    %100 = vector.shape_cast %99 : vector<2x64xbf16> to vector<1x2x64xbf16>
    %101 = arith.index_cast %c2_i32 : i32 to index
    %c0_30 = arith.constant 0 : index
    %c0_31 = arith.constant 0 : index
    %102 = vector.load %arg8[%101, %c0_30, %c0_31] : memref<8x2x64xbf16, #tpu.memory_space<vmem>>, vector<1x2x64xbf16>
    tpu.vector_store %arg8[%101, %c0_30, %c0_31], %100 {strides = array<i32>} : memref<8x2x64xbf16, #tpu.memory_space<vmem>>, vector<1x2x64xbf16>,
    %c3_i32 = arith.constant 3 : i32
    %103 = arith.index_cast %c3_i32 : i32 to index
    %c0_32 = arith.constant 0 : index
    %c0_33 = arith.constant 0 : index
    %104 = vector.load %arg10[%103, %c0_32, %c0_33] : memref<8x2x192xbf16, #tpu.memory_space<vmem>>, vector<1x2x192xbf16>
    %105 = vector.shape_cast %104 : vector<1x2x192xbf16> to vector<2x192xbf16>
    %106 = arith.extf %105 : vector<2x192xbf16> to vector<2x192xf32>
    %107 = arith.truncf %98 : vector<2x64xf32> to vector<2x64xbf16>
    %cst_34 = arith.constant dense<0.000000e+00> : vector<2x192xf32>
    %108 = tpu.matmul %107, %10, %cst_34 {dimension_numbers = #tpu.dot_dimension_numbers<[1], [0], [0], [1], [0, 0, 1, 1], [], []>} : vector<2x64xbf16>, vector<64x192xbf16>, vector<2x192xf32> -> vector<2x192xf32>
    %109 = vector.extract_strided_slice %106 {offsets = [0, 0], sizes = [2, 128], strides = [1, 1]} : vector<2x192xf32> to vector<2x128xf32>
    %110 = vector.extract_strided_slice %108 {offsets = [0, 0], sizes = [2, 128], strides = [1, 1]} : vector<2x192xf32> to vector<2x128xf32>
    %111 = arith.addf %109, %110 : vector<2x128xf32>
    %112 = arith.negf %111 : vector<2x128xf32>
    %113 = math.exp %112 : vector<2x128xf32>
    %cst_35 = arith.constant 1.000000e+00 : f32
    %114 = vector.broadcast %cst_35 : f32 to vector<2x128xf32>
    %115 = arith.addf %114, %113 : vector<2x128xf32>
    %116 = arith.divf %114, %115 : vector<2x128xf32>
    %117 = vector.extract_strided_slice %116 {offsets = [0, 0], sizes = [2, 64], strides = [1, 1]} : vector<2x128xf32> to vector<2x64xf32>
    %118 = vector.extract_strided_slice %116 {offsets = [0, 64], sizes = [2, 64], strides = [1, 1]} : vector<2x128xf32> to vector<2x64xf32>
    %119 = vector.extract_strided_slice %106 {offsets = [0, 128], sizes = [2, 64], strides = [1, 1]} : vector<2x192xf32> to vector<2x64xf32>
    %120 = vector.extract_strided_slice %108 {offsets = [0, 128], sizes = [2, 64], strides = [1, 1]} : vector<2x192xf32> to vector<2x64xf32>
    %121 = vector.broadcast %11 : vector<1x64xf32> to vector<2x64xf32>
    %122 = arith.addf %120, %121 : vector<2x64xf32>
    %123 = arith.mulf %117, %122 : vector<2x64xf32>
    %124 = arith.addf %119, %123 : vector<2x64xf32>
    %125 = math.tanh %124 : vector<2x64xf32>
    %126 = arith.subf %98, %125 : vector<2x64xf32>
    %127 = arith.mulf %118, %126 : vector<2x64xf32>
    %128 = arith.addf %125, %127 : vector<2x64xf32>
    %129 = arith.truncf %128 : vector<2x64xf32> to vector<2x64xbf16>
    %130 = vector.shape_cast %129 : vector<2x64xbf16> to vector<1x2x64xbf16>
    %131 = arith.index_cast %c3_i32 : i32 to index
    %c0_36 = arith.constant 0 : index
    %c0_37 = arith.constant 0 : index
    %132 = vector.load %arg8[%131, %c0_36, %c0_37] : memref<8x2x64xbf16, #tpu.memory_space<vmem>>, vector<1x2x64xbf16>
    tpu.vector_store %arg8[%131, %c0_36, %c0_37], %130 {strides = array<i32>} : memref<8x2x64xbf16, #tpu.memory_space<vmem>>, vector<1x2x64xbf16>,
    %c4_i32 = arith.constant 4 : i32
    %133 = arith.index_cast %c4_i32 : i32 to index
    %c0_38 = arith.constant 0 : index
    %c0_39 = arith.constant 0 : index
    %134 = vector.load %arg10[%133, %c0_38, %c0_39] : memref<8x2x192xbf16, #tpu.memory_space<vmem>>, vector<1x2x192xbf16>
    %135 = vector.shape_cast %134 : vector<1x2x192xbf16> to vector<2x192xbf16>
    %136 = arith.extf %135 : vector<2x192xbf16> to vector<2x192xf32>
    %137 = arith.truncf %128 : vector<2x64xf32> to vector<2x64xbf16>
    %cst_40 = arith.constant dense<0.000000e+00> : vector<2x192xf32>
    %138 = tpu.matmul %137, %10, %cst_40 {dimension_numbers = #tpu.dot_dimension_numbers<[1], [0], [0], [1], [0, 0, 1, 1], [], []>} : vector<2x64xbf16>, vector<64x192xbf16>, vector<2x192xf32> -> vector<2x192xf32>
    %139 = vector.extract_strided_slice %136 {offsets = [0, 0], sizes = [2, 128], strides = [1, 1]} : vector<2x192xf32> to vector<2x128xf32>
    %140 = vector.extract_strided_slice %138 {offsets = [0, 0], sizes = [2, 128], strides = [1, 1]} : vector<2x192xf32> to vector<2x128xf32>
    %141 = arith.addf %139, %140 : vector<2x128xf32>
    %142 = arith.negf %141 : vector<2x128xf32>
    %143 = math.exp %142 : vector<2x128xf32>
    %cst_41 = arith.constant 1.000000e+00 : f32
    %144 = vector.broadcast %cst_41 : f32 to vector<2x128xf32>
    %145 = arith.addf %144, %143 : vector<2x128xf32>
    %146 = arith.divf %144, %145 : vector<2x128xf32>
    %147 = vector.extract_strided_slice %146 {offsets = [0, 0], sizes = [2, 64], strides = [1, 1]} : vector<2x128xf32> to vector<2x64xf32>
    %148 = vector.extract_strided_slice %146 {offsets = [0, 64], sizes = [2, 64], strides = [1, 1]} : vector<2x128xf32> to vector<2x64xf32>
    %149 = vector.extract_strided_slice %136 {offsets = [0, 128], sizes = [2, 64], strides = [1, 1]} : vector<2x192xf32> to vector<2x64xf32>
    %150 = vector.extract_strided_slice %138 {offsets = [0, 128], sizes = [2, 64], strides = [1, 1]} : vector<2x192xf32> to vector<2x64xf32>
    %151 = vector.broadcast %11 : vector<1x64xf32> to vector<2x64xf32>
    %152 = arith.addf %150, %151 : vector<2x64xf32>
    %153 = arith.mulf %147, %152 : vector<2x64xf32>
    %154 = arith.addf %149, %153 : vector<2x64xf32>
    %155 = math.tanh %154 : vector<2x64xf32>
    %156 = arith.subf %128, %155 : vector<2x64xf32>
    %157 = arith.mulf %148, %156 : vector<2x64xf32>
    %158 = arith.addf %155, %157 : vector<2x64xf32>
    %159 = arith.truncf %158 : vector<2x64xf32> to vector<2x64xbf16>
    %160 = vector.shape_cast %159 : vector<2x64xbf16> to vector<1x2x64xbf16>
    %161 = arith.index_cast %c4_i32 : i32 to index
    %c0_42 = arith.constant 0 : index
    %c0_43 = arith.constant 0 : index
    %162 = vector.load %arg8[%161, %c0_42, %c0_43] : memref<8x2x64xbf16, #tpu.memory_space<vmem>>, vector<1x2x64xbf16>
    tpu.vector_store %arg8[%161, %c0_42, %c0_43], %160 {strides = array<i32>} : memref<8x2x64xbf16, #tpu.memory_space<vmem>>, vector<1x2x64xbf16>,
    %c5_i32 = arith.constant 5 : i32
    %163 = arith.index_cast %c5_i32 : i32 to index
    %c0_44 = arith.constant 0 : index
    %c0_45 = arith.constant 0 : index
    %164 = vector.load %arg10[%163, %c0_44, %c0_45] : memref<8x2x192xbf16, #tpu.memory_space<vmem>>, vector<1x2x192xbf16>
    %165 = vector.shape_cast %164 : vector<1x2x192xbf16> to vector<2x192xbf16>
    %166 = arith.extf %165 : vector<2x192xbf16> to vector<2x192xf32>
    %167 = arith.truncf %158 : vector<2x64xf32> to vector<2x64xbf16>
    %cst_46 = arith.constant dense<0.000000e+00> : vector<2x192xf32>
    %168 = tpu.matmul %167, %10, %cst_46 {dimension_numbers = #tpu.dot_dimension_numbers<[1], [0], [0], [1], [0, 0, 1, 1], [], []>} : vector<2x64xbf16>, vector<64x192xbf16>, vector<2x192xf32> -> vector<2x192xf32>
    %169 = vector.extract_strided_slice %166 {offsets = [0, 0], sizes = [2, 128], strides = [1, 1]} : vector<2x192xf32> to vector<2x128xf32>
    %170 = vector.extract_strided_slice %168 {offsets = [0, 0], sizes = [2, 128], strides = [1, 1]} : vector<2x192xf32> to vector<2x128xf32>
    %171 = arith.addf %169, %170 : vector<2x128xf32>
    %172 = arith.negf %171 : vector<2x128xf32>
    %173 = math.exp %172 : vector<2x128xf32>
    %cst_47 = arith.constant 1.000000e+00 : f32
    %174 = vector.broadcast %cst_47 : f32 to vector<2x128xf32>
    %175 = arith.addf %174, %173 : vector<2x128xf32>
    %176 = arith.divf %174, %175 : vector<2x128xf32>
    %177 = vector.extract_strided_slice %176 {offsets = [0, 0], sizes = [2, 64], strides = [1, 1]} : vector<2x128xf32> to vector<2x64xf32>
    %178 = vector.extract_strided_slice %176 {offsets = [0, 64], sizes = [2, 64], strides = [1, 1]} : vector<2x128xf32> to vector<2x64xf32>
    %179 = vector.extract_strided_slice %166 {offsets = [0, 128], sizes = [2, 64], strides = [1, 1]} : vector<2x192xf32> to vector<2x64xf32>
    %180 = vector.extract_strided_slice %168 {offsets = [0, 128], sizes = [2, 64], strides = [1, 1]} : vector<2x192xf32> to vector<2x64xf32>
    %181 = vector.broadcast %11 : vector<1x64xf32> to vector<2x64xf32>
    %182 = arith.addf %180, %181 : vector<2x64xf32>
    %183 = arith.mulf %177, %182 : vector<2x64xf32>
    %184 = arith.addf %179, %183 : vector<2x64xf32>
    %185 = math.tanh %184 : vector<2x64xf32>
    %186 = arith.subf %158, %185 : vector<2x64xf32>
    %187 = arith.mulf %178, %186 : vector<2x64xf32>
    %188 = arith.addf %185, %187 : vector<2x64xf32>
    %189 = arith.truncf %188 : vector<2x64xf32> to vector<2x64xbf16>
    %190 = vector.shape_cast %189 : vector<2x64xbf16> to vector<1x2x64xbf16>
    %191 = arith.index_cast %c5_i32 : i32 to index
    %c0_48 = arith.constant 0 : index
    %c0_49 = arith.constant 0 : index
    %192 = vector.load %arg8[%191, %c0_48, %c0_49] : memref<8x2x64xbf16, #tpu.memory_space<vmem>>, vector<1x2x64xbf16>
    tpu.vector_store %arg8[%191, %c0_48, %c0_49], %190 {strides = array<i32>} : memref<8x2x64xbf16, #tpu.memory_space<vmem>>, vector<1x2x64xbf16>,
    %c6_i32 = arith.constant 6 : i32
    %193 = arith.index_cast %c6_i32 : i32 to index
    %c0_50 = arith.constant 0 : index
    %c0_51 = arith.constant 0 : index
    %194 = vector.load %arg10[%193, %c0_50, %c0_51] : memref<8x2x192xbf16, #tpu.memory_space<vmem>>, vector<1x2x192xbf16>
    %195 = vector.shape_cast %194 : vector<1x2x192xbf16> to vector<2x192xbf16>
    %196 = arith.extf %195 : vector<2x192xbf16> to vector<2x192xf32>
    %197 = arith.truncf %188 : vector<2x64xf32> to vector<2x64xbf16>
    %cst_52 = arith.constant dense<0.000000e+00> : vector<2x192xf32>
    %198 = tpu.matmul %197, %10, %cst_52 {dimension_numbers = #tpu.dot_dimension_numbers<[1], [0], [0], [1], [0, 0, 1, 1], [], []>} : vector<2x64xbf16>, vector<64x192xbf16>, vector<2x192xf32> -> vector<2x192xf32>
    %199 = vector.extract_strided_slice %196 {offsets = [0, 0], sizes = [2, 128], strides = [1, 1]} : vector<2x192xf32> to vector<2x128xf32>
    %200 = vector.extract_strided_slice %198 {offsets = [0, 0], sizes = [2, 128], strides = [1, 1]} : vector<2x192xf32> to vector<2x128xf32>
    %201 = arith.addf %199, %200 : vector<2x128xf32>
    %202 = arith.negf %201 : vector<2x128xf32>
    %203 = math.exp %202 : vector<2x128xf32>
    %cst_53 = arith.constant 1.000000e+00 : f32
    %204 = vector.broadcast %cst_53 : f32 to vector<2x128xf32>
    %205 = arith.addf %204, %203 : vector<2x128xf32>
    %206 = arith.divf %204, %205 : vector<2x128xf32>
    %207 = vector.extract_strided_slice %206 {offsets = [0, 0], sizes = [2, 64], strides = [1, 1]} : vector<2x128xf32> to vector<2x64xf32>
    %208 = vector.extract_strided_slice %206 {offsets = [0, 64], sizes = [2, 64], strides = [1, 1]} : vector<2x128xf32> to vector<2x64xf32>
    %209 = vector.extract_strided_slice %196 {offsets = [0, 128], sizes = [2, 64], strides = [1, 1]} : vector<2x192xf32> to vector<2x64xf32>
    %210 = vector.extract_strided_slice %198 {offsets = [0, 128], sizes = [2, 64], strides = [1, 1]} : vector<2x192xf32> to vector<2x64xf32>
    %211 = vector.broadcast %11 : vector<1x64xf32> to vector<2x64xf32>
    %212 = arith.addf %210, %211 : vector<2x64xf32>
    %213 = arith.mulf %207, %212 : vector<2x64xf32>
    %214 = arith.addf %209, %213 : vector<2x64xf32>
    %215 = math.tanh %214 : vector<2x64xf32>
    %216 = arith.subf %188, %215 : vector<2x64xf32>
    %217 = arith.mulf %208, %216 : vector<2x64xf32>
    %218 = arith.addf %215, %217 : vector<2x64xf32>
    %219 = arith.truncf %218 : vector<2x64xf32> to vector<2x64xbf16>
    %220 = vector.shape_cast %219 : vector<2x64xbf16> to vector<1x2x64xbf16>
    %221 = arith.index_cast %c6_i32 : i32 to index
    %c0_54 = arith.constant 0 : index
    %c0_55 = arith.constant 0 : index
    %222 = vector.load %arg8[%221, %c0_54, %c0_55] : memref<8x2x64xbf16, #tpu.memory_space<vmem>>, vector<1x2x64xbf16>
    tpu.vector_store %arg8[%221, %c0_54, %c0_55], %220 {strides = array<i32>} : memref<8x2x64xbf16, #tpu.memory_space<vmem>>, vector<1x2x64xbf16>,
    %c7_i32 = arith.constant 7 : i32
    %223 = arith.index_cast %c7_i32 : i32 to index
    %c0_56 = arith.constant 0 : index
    %c0_57 = arith.constant 0 : index
    %224 = vector.load %arg10[%223, %c0_56, %c0_57] : memref<8x2x192xbf16, #tpu.memory_space<vmem>>, vector<1x2x192xbf16>
    %225 = vector.shape_cast %224 : vector<1x2x192xbf16> to vector<2x192xbf16>
    %226 = arith.extf %225 : vector<2x192xbf16> to vector<2x192xf32>
    %227 = arith.truncf %218 : vector<2x64xf32> to vector<2x64xbf16>
    %cst_58 = arith.constant dense<0.000000e+00> : vector<2x192xf32>
    %228 = tpu.matmul %227, %10, %cst_58 {dimension_numbers = #tpu.dot_dimension_numbers<[1], [0], [0], [1], [0, 0, 1, 1], [], []>} : vector<2x64xbf16>, vector<64x192xbf16>, vector<2x192xf32> -> vector<2x192xf32>
    %229 = vector.extract_strided_slice %226 {offsets = [0, 0], sizes = [2, 128], strides = [1, 1]} : vector<2x192xf32> to vector<2x128xf32>
    %230 = vector.extract_strided_slice %228 {offsets = [0, 0], sizes = [2, 128], strides = [1, 1]} : vector<2x192xf32> to vector<2x128xf32>
    %231 = arith.addf %229, %230 : vector<2x128xf32>
    %232 = arith.negf %231 : vector<2x128xf32>
    %233 = math.exp %232 : vector<2x128xf32>
    %cst_59 = arith.constant 1.000000e+00 : f32
    %234 = vector.broadcast %cst_59 : f32 to vector<2x128xf32>
    %235 = arith.addf %234, %233 : vector<2x128xf32>
    %236 = arith.divf %234, %235 : vector<2x128xf32>
    %237 = vector.extract_strided_slice %236 {offsets = [0, 0], sizes = [2, 64], strides = [1, 1]} : vector<2x128xf32> to vector<2x64xf32>
    %238 = vector.extract_strided_slice %236 {offsets = [0, 64], sizes = [2, 64], strides = [1, 1]} : vector<2x128xf32> to vector<2x64xf32>
    %239 = vector.extract_strided_slice %226 {offsets = [0, 128], sizes = [2, 64], strides = [1, 1]} : vector<2x192xf32> to vector<2x64xf32>
    %240 = vector.extract_strided_slice %228 {offsets = [0, 128], sizes = [2, 64], strides = [1, 1]} : vector<2x192xf32> to vector<2x64xf32>
    %241 = vector.broadcast %11 : vector<1x64xf32> to vector<2x64xf32>
    %242 = arith.addf %240, %241 : vector<2x64xf32>
    %243 = arith.mulf %237, %242 : vector<2x64xf32>
    %244 = arith.addf %239, %243 : vector<2x64xf32>
    %245 = math.tanh %244 : vector<2x64xf32>
    %246 = arith.subf %218, %245 : vector<2x64xf32>
    %247 = arith.mulf %238, %246 : vector<2x64xf32>
    %248 = arith.addf %245, %247 : vector<2x64xf32>
    %249 = arith.truncf %248 : vector<2x64xf32> to vector<2x64xbf16>
    %250 = vector.shape_cast %249 : vector<2x64xbf16> to vector<1x2x64xbf16>
    %251 = arith.index_cast %c7_i32 : i32 to index
    %c0_60 = arith.constant 0 : index
    %c0_61 = arith.constant 0 : index
    %252 = vector.load %arg8[%251, %c0_60, %c0_61] : memref<8x2x64xbf16, #tpu.memory_space<vmem>>, vector<1x2x64xbf16>
    tpu.vector_store %arg8[%251, %c0_60, %c0_61], %250 {strides = array<i32>} : memref<8x2x64xbf16, #tpu.memory_space<vmem>>, vector<1x2x64xbf16>,
    %c8_i32 = arith.constant 8 : i32
    %c0_62 = arith.constant 0 : index
    %c0_63 = arith.constant 0 : index
    %253 = vector.load %arg6[%c0_62, %c0_63] : memref<64x32xf32, #tpu.memory_space<vmem>>, vector<64x32xf32>
    %cst_64 = arith.constant dense<0.000000e+00> : vector<2x32xf32>
    %254 = tpu.matmul %248, %253, %cst_64 {dimension_numbers = #tpu.dot_dimension_numbers<[1], [0], [0], [1], [0, 0, 1, 1], [], []>} : vector<2x64xf32>, vector<64x32xf32>, vector<2x32xf32> -> vector<2x32xf32>
    %c0_65 = arith.constant 0 : index
    %c0_66 = arith.constant 0 : index
    %255 = vector.load %arg7[%c0_65, %c0_66] : memref<1x32xf32, #tpu.memory_space<vmem>>, vector<1x32xf32>
    %256 = vector.broadcast %255 : vector<1x32xf32> to vector<2x32xf32>
    %257 = arith.addf %254, %256 : vector<2x32xf32>
    %258 = math.tanh %257 : vector<2x32xf32>
    %c0_67 = arith.constant 0 : index
    %c0_68 = arith.constant 0 : index
    %259 = vector.load %arg9[%c0_67, %c0_68] : memref<2x32xf32, #tpu.memory_space<vmem>>, vector<2x32xf32>
    tpu.vector_store %arg9[%c0_67, %c0_68], %258 {strides = array<i32>} : memref<2x32xf32, #tpu.memory_space<vmem>>, vector<2x32xf32>,
    return
  }
  func.func @transform_0(%arg0: i32) -> (i32, i32, i32) {
    %c0_i32 = arith.constant 0 : i32
    %c0_i32_0 = arith.constant 0 : i32
    %c0_i32_1 = arith.constant 0 : i32
    %c0_i32_2 = arith.constant 0 : i32
    return %c0_i32, %c0_i32_0, %c0_i32_1 : i32, i32, i32
  }
  func.func @transform_1(%arg0: i32) -> (i32, i32) {
    %c0_i32 = arith.constant 0 : i32
    %c0_i32_0 = arith.constant 0 : i32
    %c0_i32_1 = arith.constant 0 : i32
    return %c0_i32, %c0_i32_0 : i32, i32
  }
  func.func @transform_2(%arg0: i32) -> (i32, i32) {
    %c0_i32 = arith.constant 0 : i32
    %c0_i32_0 = arith.constant 0 : i32
    %c0_i32_1 = arith.constant 0 : i32
    return %c0_i32, %c0_i32_0 : i32, i32
  }
  func.func @transform_3(%arg0: i32) -> (i32, i32) {
    %c0_i32 = arith.constant 0 : i32
    %c0_i32_0 = arith.constant 0 : i32
    %c0_i32_1 = arith.constant 0 : i32
    return %c0_i32, %c0_i32_0 : i32, i32
  }
  func.func @transform_4(%arg0: i32) -> (i32, i32) {
    %c0_i32 = arith.constant 0 : i32
    %c0_i32_0 = arith.constant 0 : i32
    %c0_i32_1 = arith.constant 0 : i32
    return %c0_i32, %c0_i32_0 : i32, i32
  }
  func.func @transform_5(%arg0: i32) -> (i32, i32) {
    %c0_i32 = arith.constant 0 : i32
    %c0_i32_0 = arith.constant 0 : i32
    %c0_i32_1 = arith.constant 0 : i32
    return %c0_i32, %c0_i32_0 : i32, i32
  }
  func.func @transform_6(%arg0: i32) -> (i32, i32) {
    %c0_i32 = arith.constant 0 : i32
    %c0_i32_0 = arith.constant 0 : i32
    %c0_i32_1 = arith.constant 0 : i32
    return %c0_i32, %c0_i32_0 : i32, i32
  }
  func.func @transform_7(%arg0: i32) -> (i32, i32, i32) {
    %c0_i32 = arith.constant 0 : i32
    %c0_i32_0 = arith.constant 0 : i32
    %c0_i32_1 = arith.constant 0 : i32
    %c0_i32_2 = arith.constant 0 : i32
    return %c0_i32, %c0_i32_0, %c0_i32_1 : i32, i32, i32
  }
  func.func @transform_8(%arg0: i32) -> (i32, i32) {
    %c0_i32 = arith.constant 0 : i32
    %c0_i32_0 = arith.constant 0 : i32
    %c0_i32_1 = arith.constant 0 : i32
    return %c0_i32, %c0_i32_0 : i32, i32
  }
}

</mosaic_0001>

<bundles_post_ra>
// kernel: tpu_custom_call.1
= control target key start
LH: loop header
LB: loop body
LE: loop exit
PB: predicated region body
PF: predicated region fallthrough
CT: control target
= control target key end

     0   :  { %14 = vsyncpa [#allocation4], 0  ;;  %s1888_s0 = inlined_call_operand.vmem [shape: bf16[8,2,64], index: 0, kind: input, shape index: {}]   ;;  %s1889_s1 = inlined_call_operand.vmem [shape: bf16[64,192], index: 1, kind: input, shape index: {}]   ;;  %s1890_s2 = inlined_call_operand.vmem [shape: f32[1,192], index: 2, kind: input, shape index: {}]   ;;  %s1891_s3 = inlined_call_operand.hbm [shape: bf16[64,192], index: 3, kind: input, shape index: {}]   ;;  %s1892_s4 = inlined_call_operand.vmem [shape: f32[1,64], index: 4, kind: input, shape index: {}]   ;;  %s1893_s5 = inlined_call_operand.vmem [shape: f32[64,32], index: 5, kind: input, shape index: {}]   ;;  %s1894_s6 = inlined_call_operand.vmem [shape: f32[1,32], index: 6, kind: input, shape index: {}]   ;;  %s1895_s7 = inlined_call_operand.hbm [shape: bf16[8,2,64], index: 7, kind: output, shape index: {0}]   ;;  %s1896_s8 = inlined_call_operand.hbm [shape: f32[2,32], index: 8, kind: output, shape index: {1}]  }
   0x1   :  { %15 = vsyncpa [#allocation5], 0 }
   0x2   :  { %16 = vsyncpa [#allocation8], 0  ;;  %s1527_s27 = smov [#allocation3]   ;;  %s1455_s9 = scalar_lea.hbm %s1891_s3, 1024 }
   0x3   :  { %s28_s28 = sshll.u32 %s1527_s27, 4  ;;  %p1456_p0 = scmp.ne.s32.totalorder %s1891_s3, %s1455_s9  ;;  %s29_s28 = int_to_ptr.vmem [resolvable:$true] %s28_s28 }
   0x4   :  { %p1459_p1 = scmp.lt.u32.totalorder %s1455_s9, %s1891_s3 }
   0x6   :  { %p1461_p2 = pnand %p1459_p1, %p1456_p0 }
   0x8   :  { %1464 = shalt.err (!%p1461_p2)
}
   0x9   :  { %s1465_s14 = scalar_lea.vmem %s29_s28, 1024  ;;  %p1470_p4 = scmp.lt.s32.totalorder %s29_s28, %s29_s28 }
   0xa   :  { %p1466_p3 = scmp.ne.s32.totalorder %s29_s28, %s1465_s14  ;;  %p1471_p5 = scmp.lt.s32.totalorder %s1465_s14, %s1465_s14 }
   0xc   :  { %p1472_p6 = por %p1471_p5, %p1470_p4 }
   0xe   :  { %p1473_p7 = pnand %p1472_p6, %p1466_p3 }
  0x10   :  { %1476 = shalt.err (!%p1473_p7)
}
  0x11   :  { %s1528_s15 = smov 128   ;;  %s1529_s16 = smov 8  }
  0x12   :  { %34 = dma.hbm_to_vmem [thread:$0]  %s1891_s3, 1024, %s29_s28, [#allocation4], %s1528_s15, %s1528_s15, %s1529_s16  }
  0x13   :  { %1521 = dma.done.wait [#allocation4], 1024  }
  0x14   :  { %1522 = vsyncadd [#allocation4], 4294966272  ;;  %v1530_v0 = vmov 0   ;;  %v63_v1 = vlaneseq  ;;  %v1531_v2 = vmov 1966171168   ;;  %vm170_vm0 = vcmask 523264  }
  0x15   :  { %206 = vmatprep.mubr.bf16.mxu0 %v1530_v0  ;;  %594 = vmatprep.mubr.bf16.mxu1 %v1530_v0  ;;  %v86_v3 = vunpack.c.l.s4 %v1531_v2  ;;  %v1381_v4 = vld [vmem:[%s1889_s1 + $0x4] ss:$8 sps:$4 sm:$0xff]   ;;  %v1383_v7 = vld [vmem:[%s1889_s1] ss:$8 sps:$4 sm:$0xff]   ;;  %v1384_v8 = vld [vmem:[%s1889_s1 + $0x14] ss:$8 sps:$4 sm:$0xff]  }
  0x16   :  { %v1603_v5 = vshrl.u32 %v63_v1, 7  ;;  %174 = vmatprep.subr.bf16.mxu0 %v1381_v4  ;;  %v1386_v9 = vld [vmem:[%s1889_s1 + $0x10] ss:$8 sps:$4 sm:$0xff]   ;;  %v1387_v10 = vld [vmem:[%s1889_s1 + $0x24] ss:$8 sps:$4 sm:$0xff]   ;;  %vm497_vm1 = vcmask 1040384  }
  0x17   :  { %v87_v6 = vunpack.c.0.s8 %v86_v3  ;;  %175 = vmatpush1.bf16.msra.mxu0 %v1383_v7  ;;  %v1389_v12 = vld [vmem:[%s1889_s1 + $0x20] ss:$8 sps:$4 sm:$0xff]   ;;  %v1390_v15 = vld [vmem:[%s1889_s1 + $0x34] ss:$8 sps:$4 sm:$0xff]   ;;  %v58_v18 = vld [vmem:[%s1888_s0 + $0x4] sm:$0x1] }
  0x18   :  { %176 = vmatprep.subr.bf16.mxu0 %v1384_v8  ;;  %v54_v13 = vld [vmem:[%s1888_s0] sm:$0x1]  ;;  %v55_v14 = vld [vmem:[%s1888_s0 + $0x1] sm:$0x1]  ;;  %v56_v16 = vld [vmem:[%s1888_s0 + $0x2] sm:$0x1] }
  0x19   :  { %v1618_v11 = vsub.s32 %v87_v6, %v1603_v5  ;;  %v57_v17 = vld [vmem:[%s1888_s0 + $0x3] sm:$0x1]  ;;  %v81_v19 = vcombine.low %v54_v13, %v55_v14  ;;  %v59_v20 = vld [vmem:[%s1888_s0 + $0x5] sm:$0x1]  ;;  %v60_v21 = vld [vmem:[%s1888_s0 + $0x6] sm:$0x1] }
  0x1a   :  { %v61_v22 = vld [vmem:[%s1888_s0 + $0x7] sm:$0x1]  ;;  %v82_v23 = vcombine.low %v56_v16, %v57_v17  ;;  %v83_v24 = vcombine.low %v58_v18, %v59_v20  ;;  %v1651_v27 = vld [vmem:[#allocation3 + $0x4] ss:$8 sps:$4 sm:$0xff]   ;;  %v1654_v29 = vld [vmem:[#allocation3] ss:$8 sps:$4 sm:$0xff]  }
  0x1b   :  { %177 = vmatpush1.bf16.msra.mxu0 %v1386_v9  ;;  %v84_v25 = vcombine.low %v60_v21, %v61_v22  ;;  %v91_v26 = vrot.slane %v81_v19, %v1618_v11  ;;  %562 = vmatprep.subr.bf16.mxu1 %v1651_v27  ;;  %v1659_v32 = vld [vmem:[#allocation3 + $0x14] ss:$8 sps:$4 sm:$0xff]   ;;  %v1392_v33 = vld [vmem:[%s1889_s1 + $0x30] ss:$8 sps:$4 sm:$0xff]   ;;  %v1665_v35 = vld [vmem:[#allocation3 + $0x10] ss:$8 sps:$4 sm:$0xff]  }
  0x1c   :  { %178 = vmatprep.subr.bf16.mxu0 %v1387_v10  ;;  %v98_v28 = vrot.slane %v82_v23, %v1618_v11  ;;  %v105_v30 = vrot.slane %v83_v24, %v1618_v11  ;;  %563 = vmatpush1.bf16.msra.mxu1 %v1654_v29  ;;  %v1668_v37 = vld [vmem:[#allocation3 + $0x24] ss:$8 sps:$4 sm:$0xff]   ;;  %v1673_v40 = vld [vmem:[#allocation3 + $0x20] ss:$8 sps:$4 sm:$0xff]   ;;  %v1676_v42 = vld [vmem:[#allocation3 + $0x34] ss:$8 sps:$4 sm:$0xff]  }
  0x1d   :  { %v112_v31 = vrot.slane %v84_v25, %v1618_v11  ;;  %564 = vmatprep.subr.bf16.mxu1 %v1659_v32  ;;  %v1681_v43 = vld [vmem:[#allocation3 + $0x30] ss:$8 sps:$4 sm:$0xff]   ;;  %v65_v44 = vsub.s32 0, %v1603_v5  ;;  %v69_v46 = vsub.s32 1, %v1603_v5  ;;  %v1532_v47 = vmov 1983009808  }
  0x1e   :  { %v113_v34 = vcombine.low %v91_v26, %v98_v28  ;;  %v53_v45 = vld [vmem:[%s1890_s2] sm:$0x3]  ;;  %v224_v48 = vunpack.c.l.s4 %v1532_v47  ;;  %vm498_vm2 = vcmask 517121   ;;  %s1533_s28 = smov 64   ;;  %vm635_vm4 = vcmask 516096  }
  0x1f   :  { %179 = vmatpush1.bf16.msra.mxu0 %v1389_v12  ;;  %v114_v36 = vcombine.low %v105_v30, %v112_v31  ;;  %v66_v49 = vrot.slane %v53_v45, %v65_v44  ;;  %v70_v50 = vrot.slane %v53_v45, %v69_v46  ;;  %vm1715_vm3 = vmor %vm498_vm2, %vm497_vm1  ;;  %vm1535_vm5 = vmmov 0  }
  0x20   :  { %180 = vmatprep.subr.bf16.mxu0 %v1390_v15  ;;  %v121_v38 = vrot.slane %v113_v34, %v1618_v11  ;;  %565 = vmatpush1.bf16.msra.mxu1 %v1665_v35  ;;  %v225_v51 = vunpack.c.0.s8 %v224_v48 }
  0x21   :  { %v128_v39 = vrot.slane %v114_v36, %v1618_v11  ;;  %566 = vmatprep.subr.bf16.mxu1 %v1668_v37 }
  0x22   :  { %v228_v56 = vsub.s32 %v225_v51, %v1603_v5 }
  0x23   :  { %181 = vmatpush1.bf16.msra.mxu0 %v1392_v33  ;;  %v129_v41 = vcombine.low %v121_v38, %v128_v39 }
  0x24   :  { %643 = vmatprep.subr.bf16.mxu0 %v1651_v27  ;;  %567 = vmatpush1.bf16.msra.mxu1 %v1673_v40 }
  0x25   :  { %568 = vmatprep.subr.bf16.mxu1 %v1676_v42 }
  0x26   :  { %1292 = vmatmul.mubr.msk.bf16.vlgmr.msra.gmra.mrb[0].mxu0 %vm170_vm0, %v129_v41 }
  0x27   :  { %644 = vmatpush1.bf16.msra.mxu0 %v1654_v29  ;;  %675 = vmatprep.mubr.bf16.mxu0 %v1530_v0 }
  0x28   :  { %645 = vmatprep.subr.bf16.mxu0 %v1659_v32  ;;  %569 = vmatpush1.bf16.msra.mxu1 %v1681_v43 }
  0x29   :  { %718 = vmatprep.subr.bf16.mxu1 %v1651_v27 }
  0x2b   :  { %646 = vmatpush1.bf16.msra.mxu0 %v1665_v35  ;;  %595 = vmatmul.mubr.bf16.vlgmr.msra.gmra.mrb[0].mxu1 %v1530_v0 }
  0x2c   :  { %647 = vmatprep.subr.bf16.mxu0 %v1668_v37  ;;  %719 = vmatpush1.bf16.msra.mxu1 %v1654_v29 }
  0x2d   :  { %720 = vmatprep.subr.bf16.mxu1 %v1659_v32  ;;  %750 = vmatprep.mubr.bf16.mxu1 %v1530_v0 }
  0x2f   :  { %648 = vmatpush1.bf16.msra.mxu0 %v1673_v40 }
  0x30   :  { %649 = vmatprep.subr.bf16.mxu0 %v1676_v42  ;;  %721 = vmatpush1.bf16.msra.mxu1 %v1665_v35 }
  0x31   :  { %722 = vmatprep.subr.bf16.mxu1 %v1668_v37 }
  0x33   :  { %650 = vmatpush1.bf16.msra.mxu0 %v1681_v43 }
  0x34   :  { %793 = vmatprep.subr.bf16.mxu0 %v1651_v27  ;;  %723 = vmatpush1.bf16.msra.mxu1 %v1673_v40 }
  0x35   :  { %724 = vmatprep.subr.bf16.mxu1 %v1676_v42 }
  0x38   :  { %725 = vmatpush1.bf16.msra.mxu1 %v1681_v43 }
  0x39   :  { %868 = vmatprep.subr.bf16.mxu1 %v1651_v27 }
  0xf9   :  { %v208_v52 = vpop.f32.mrb[0].mxu0 }
  0xfa   :  { %v209_v53 = vadd.f32 %v208_v52, %v66_v49  ;;  %v210_v54 = vpop.f32.mrb[1].mxu0 }
  0xfb   :  { %v211_v55 = vadd.f32 %v210_v54, %v70_v50  ;;  %v212_v57 = vpop.f32.mrb[2].mxu0 }
  0xfc   :  { %v213_v58 = vadd.f32 %v212_v57, %v66_v49  ;;  %v214_v59 = vpop.f32.mrb[3].mxu0 }
  0xfd   :  { %v221_v60 = vcombine.low %v209_v53, %v211_v55  ;;  %v222_v61 = vcombine.high %v209_v53, %v211_v55  ;;  %v215_v62 = vadd.f32 %v214_v59, %v70_v50 }
  0xfe   :  { %v596_v9 = vpop.f32.mrb[0].mxu1 }
  0xff   :  { %v229_v63 = vrot.slane %v221_v60, %v228_v56  ;;  %v236_v1 = vrot.slane %v222_v61, %v228_v56  ;;  %v239_v2 = vcombine.low %v213_v58, %v215_v62  ;;  %v240_v3 = vcombine.high %v213_v58, %v215_v62  ;;  %v598_v5 = vpop.f32.mrb[1].mxu1 }
 0x100   :  { %v600_v17 = vpop.f32.mrb[2].mxu1 }
 0x101   :  { %v237_v4 = vcombine.high %v229_v63, %v229_v63  ;;  %v238_v6 = vcombine.high %v236_v1, %v236_v1  ;;  %v263_v7 = vrot.slane %v229_v63, %v228_v56  ;;  %v279_v8 = vrot.slane %v236_v1, %v228_v56  ;;  %v601_v22 = vpop.f32.mrb[3].mxu1 }
 0x102   :  { %v247_v10 = vrot.slane %v239_v2, %v228_v56  ;;  %v254_v12 = vrot.slane %v240_v3, %v228_v56 }
 0x103   :  { %v264_v13 = vcombine.high %v263_v7, %v263_v7  ;;  %v271_v14 = vrot.slane %v237_v4, %v228_v56  ;;  %v280_v15 = vcombine.high %v279_v8, %v279_v8  ;;  %v287_v16 = vrot.slane %v238_v6, %v228_v56 }
 0x104   :  { %v255_v18 = vcombine.high %v247_v10, %v247_v10  ;;  %v256_v19 = vcombine.high %v254_v12, %v254_v12  ;;  %v295_v20 = vrot.slane %v247_v10, %v228_v56  ;;  %v311_v21 = vrot.slane %v254_v12, %v228_v56 }
 0x105   :  { %v272_v23 = vcombine.high %v271_v14, %v271_v14  ;;  %v288_v24 = vcombine.high %v287_v16, %v287_v16  ;;  %v1293_v25 = vpack.c.bf16 %v264_v13, %v263_v7  ;;  %v1295_v26 = vpack.c.bf16 %v280_v15, %v279_v8 }
 0x106   :  { %v296_v28 = vcombine.high %v295_v20, %v295_v20  ;;  %v303_v30 = vrot.slane %v255_v18, %v228_v56  ;;  %v312_v31 = vcombine.high %v311_v21, %v311_v21  ;;  %v319_v33 = vrot.slane %v256_v19, %v228_v56 }
 0x107   :  { %v376_v34 = vrot.slane %v1293_v25, %v1618_v11  ;;  %v1294_v36 = vpack.c.bf16 %v272_v23, %v271_v14  ;;  %v406_v38 = vrot.slane %v1295_v26, %v1618_v11  ;;  %v1296_v39 = vpack.c.bf16 %v288_v24, %v287_v16 }
 0x108   :  { %v304_v44 = vcombine.high %v303_v30, %v303_v30  ;;  %v320_v45 = vcombine.high %v319_v33, %v319_v33  ;;  %v1297_v46 = vpack.c.bf16 %v296_v28, %v295_v20  ;;  %v1299_v47 = vpack.c.bf16 %v312_v31, %v311_v21 }
 0x109   :  { %v383_v48 = vrot.slane %v376_v34, %v1618_v11  ;;  %v391_v49 = vrot.slane %v1294_v36, %v1618_v11  ;;  %v413_v50 = vrot.slane %v406_v38, %v1618_v11  ;;  %v421_v51 = vrot.slane %v1296_v39, %v1618_v11 }
 0x10a   :  { %v436_v52 = vrot.slane %v1297_v46, %v1618_v11  ;;  %v1298_v53 = vpack.c.bf16 %v304_v44, %v303_v30  ;;  %v466_v54 = vrot.slane %v1299_v47, %v1618_v11  ;;  %v1300_v55 = vpack.c.bf16 %v320_v45, %v319_v33 }
 0x10b   :  { %v398_v56 = vrot.slane %v391_v49, %v1618_v11  ;;  %v428_v57 = vrot.slane %v421_v51, %v1618_v11  ;;  %500 = vst.msk [vmem:[#allocation2] sm:$0x3] %vm1715_vm3, %v383_v48  ;;  %502 = vst.msk [vmem:[#allocation2 + $0x4] sm:$0x3] %vm1715_vm3, %v413_v50 }
 0x10c   :  { %v443_v58 = vrot.slane %v436_v52, %v1618_v11  ;;  %v451_v59 = vrot.slane %v1298_v53, %v1618_v11  ;;  %v473_v60 = vrot.slane %v466_v54, %v1618_v11  ;;  %v481_v61 = vrot.slane %v1300_v55, %v1618_v11 }
 0x10d   :  { %501 = vst.msk [vmem:[#allocation2 + $0x2] sm:$0x3] %vm1715_vm3, %v398_v56  ;;  %503 = vst.msk [vmem:[#allocation2 + $0x6] sm:$0x3] %vm1715_vm3, %v428_v57 }
 0x10e   :  { %v458_v62 = vrot.slane %v451_v59, %v1618_v11  ;;  %v488_v63 = vrot.slane %v481_v61, %v1618_v11  ;;  %504 = vst.msk [vmem:[#allocation2 + $0x8] sm:$0x3] %vm1715_vm3, %v443_v58  ;;  %506 = vst.msk [vmem:[#allocation2 + $0xc] sm:$0x3] %vm1715_vm3, %v473_v60  ;;  %v1752_v11 = vld [vmem:[%s1892_s4] ss:$0 sm:$0xff] }
 0x10f   :  { %v616_v8 = vadd.f32 %v1752_v11, %v598_v5 }
 0x110   :  { %505 = vst.msk [vmem:[#allocation2 + $0xa] sm:$0x3] %vm1715_vm3, %v458_v62  ;;  %507 = vst.msk [vmem:[#allocation2 + $0xe] sm:$0x3] %vm1715_vm3, %v488_v63 }
 0x112   :  { %v517_v1 = vld [vmem:[#allocation2] sm:$0x3]  ;;  %v713_v50 = vld [vmem:[#allocation2 + $0x4] sm:$0x3] }
 0x113   :  { %v518_v2 = vunpack.c.l.bf16 %v517_v1  ;;  %v714_v51 = vunpack.c.l.bf16 %v713_v50 }
 0x114   :  { %v638_v5 = vld [vmem:[#allocation2 + $0x2] sm:$0x3] }
 0x115   :  { %v603_v3 = vadd.f32 %v596_v9, %v518_v2  ;;  %v619_v12 = vrot.slane %v518_v2, 2  ;;  %v639_v21 = vunpack.c.l.bf16 %v638_v5  ;;  %v769_v62 = vrot.slane %v714_v51, 2 }
 0x117   :  { %v1309_v4 = vmul.f32 -1.442695, %v603_v3  ;;  %v694_v36 = vrot.slane %v639_v21, 2 }
 0x119   :  { %1405 = vpow2.f32 %v1309_v4 }
 0x123   :  { %v1406_v6 = vpop.eup %1405 }
 0x124   :  { %v607_v7 = vadd.f32 1.0, %v1406_v6 }
 0x126   :  { %1407 = vrcp.f32 %v607_v7 }
 0x130   :  { %v1408_v10 = vpop.eup %1407 }
 0x131   :  { %v617_v13 = vmul.f32 %v1408_v10, %v616_v8 }
 0x133   :  { %v621_v14 = vadd.f32 %v619_v12, %v617_v13  ;;  %v788_v12 = vld [vmem:[#allocation2 + $0x6] sm:$0x3] }
 0x134   :  { %v789_v13 = vunpack.c.l.bf16 %v788_v12 }
 0x135   :  { %1409 = vtanh.f32 %v621_v14 }
 0x13f   :  { %v1410_v15 = vpop.eup %1409 }
 0x140   :  { %v623_v16 = vsub.f32 0.0, %v1410_v15 }
 0x142   :  { %625 = vrot.lane.b32.xlu0 %v623_v16, %s1533_s28 }
 0x1b4   :  { %v626_v9 = vpop.permute.xlu0 %625 }
 0x1b5   :  { %v628_v17 = vmul.f32 %v1408_v10, %v626_v9 }
 0x1b7   :  { %630 = vrot.lane.b32.xlu0 %v628_v17, %s1533_s28 }
 0x229   :  { %v631_v18 = vpop.permute.xlu0 %630 }
 0x22a   :  { %v633_v19 = vadd.f32 %v1410_v15, %v631_v18 }
 0x22c   :  { %v634_v20 = vpack.c.bf16 %v633_v19, %v633_v19 }
 0x22e   :  { %636 = vst.msk [vmem:[#allocation6] sm:$0x1] %vm635_vm4, %v634_v20  ;;  %1311 = vmatmul.mubr.msk.bf16.vlgmr.msra.gmra.mrb[4].mxu0 %vm170_vm0, %v634_v20 }
 0x22f   :  { %794 = vmatpush1.bf16.msra.mxu0 %v1654_v29  ;;  %825 = vmatprep.mubr.bf16.mxu0 %v1530_v0 }
 0x230   :  { %795 = vmatprep.subr.bf16.mxu0 %v1659_v32 }
 0x233   :  { %796 = vmatpush1.bf16.msra.mxu0 %v1665_v35 }
 0x234   :  { %797 = vmatprep.subr.bf16.mxu0 %v1668_v37 }
 0x237   :  { %798 = vmatpush1.bf16.msra.mxu0 %v1673_v40 }
 0x238   :  { %799 = vmatprep.subr.bf16.mxu0 %v1676_v42 }
 0x23b   :  { %800 = vmatpush1.bf16.msra.mxu0 %v1681_v43 }
 0x23c   :  { %943 = vmatprep.subr.bf16.mxu0 %v1651_v27 }
 0x301   :  { %v677_v22 = vpop.f32.mrb[4].mxu0 }
 0x302   :  { %v684_v23 = vadd.f32 %v677_v22, %v639_v21  ;;  %v679_v24 = vpop.f32.mrb[5].mxu0  ;;  %v844_v22 = vrot.slane %v789_v13, 2 }
 0x303   :  { %v681_v25 = vpop.f32.mrb[6].mxu0  ;;  %v691_v33 = vadd.f32 %v1752_v11, %v679_v24 }
 0x304   :  { %v1312_v26 = vmul.f32 -1.442695, %v684_v23  ;;  %v682_v28 = vpop.f32.mrb[7].mxu0 }
 0x306   :  { %1411 = vpow2.f32 %v1312_v26 }
 0x310   :  { %v1412_v30 = vpop.eup %1411 }
 0x311   :  { %v688_v31 = vadd.f32 1.0, %v1412_v30 }
 0x313   :  { %1413 = vrcp.f32 %v688_v31 }
 0x31d   :  { %v1414_v34 = vpop.eup %1413 }
 0x31e   :  { %v692_v38 = vmul.f32 %v1414_v34, %v691_v33 }
 0x320   :  { %v696_v39 = vadd.f32 %v694_v36, %v692_v38 }
 0x322   :  { %1415 = vtanh.f32 %v696_v39 }
 0x32c   :  { %v1416_v41 = vpop.eup %1415 }
 0x32d   :  { %v698_v44 = vsub.f32 %v633_v19, %v1416_v41 }
 0x32f   :  { %700 = vrot.lane.b32.xlu1 %v698_v44, %s1533_s28 }
 0x3a1   :  { %v701_v45 = vpop.permute.xlu1 %700 }
 0x3a2   :  { %v703_v46 = vmul.f32 %v1414_v34, %v701_v45  ;;  %v863_v34 = vld [vmem:[#allocation2 + $0x8] sm:$0x3] }
 0x3a3   :  { %v864_v36 = vunpack.c.l.bf16 %v863_v34 }
 0x3a4   :  { %705 = vrot.lane.b32.xlu1 %v703_v46, %s1533_s28 }
 0x416   :  { %v706_v47 = vpop.permute.xlu1 %705 }
 0x417   :  { %v708_v48 = vadd.f32 %v1416_v41, %v706_v47 }
 0x419   :  { %v709_v49 = vpack.c.bf16 %v708_v48, %v708_v48 }
 0x41b   :  { %711 = vst.msk [vmem:[#allocation6 + $0x1] sm:$0x1] %vm635_vm4, %v709_v49  ;;  %1313 = vmatmul.mubr.msk.bf16.vlgmr.msra.gmra.mrb[4].mxu1 %vm170_vm0, %v709_v49 }
 0x41c   :  { %869 = vmatpush1.bf16.msra.mxu1 %v1654_v29  ;;  %900 = vmatprep.mubr.bf16.mxu1 %v1530_v0 }
 0x41d   :  { %870 = vmatprep.subr.bf16.mxu1 %v1659_v32 }
 0x420   :  { %871 = vmatpush1.bf16.msra.mxu1 %v1665_v35 }
 0x421   :  { %872 = vmatprep.subr.bf16.mxu1 %v1668_v37 }
 0x424   :  { %873 = vmatpush1.bf16.msra.mxu1 %v1673_v40 }
 0x425   :  { %874 = vmatprep.subr.bf16.mxu1 %v1676_v42 }
 0x428   :  { %875 = vmatpush1.bf16.msra.mxu1 %v1681_v43 }
 0x429   :  { %1018 = vmatprep.subr.bf16.mxu1 %v1651_v27 }
 0x4ee   :  { %v752_v52 = vpop.f32.mrb[4].mxu1 }
 0x4ef   :  { %v759_v53 = vadd.f32 %v752_v52, %v714_v51  ;;  %v754_v54 = vpop.f32.mrb[5].mxu1  ;;  %v919_v51 = vrot.slane %v864_v36, 2 }
 0x4f0   :  { %v756_v55 = vpop.f32.mrb[6].mxu1  ;;  %v766_v60 = vadd.f32 %v1752_v11, %v754_v54 }
 0x4f1   :  { %v1314_v56 = vmul.f32 -1.442695, %v759_v53  ;;  %v757_v57 = vpop.f32.mrb[7].mxu1 }
 0x4f3   :  { %1417 = vpow2.f32 %v1314_v56 }
 0x4fd   :  { %v1418_v58 = vpop.eup %1417 }
 0x4fe   :  { %v763_v59 = vadd.f32 1.0, %v1418_v58 }
 0x500   :  { %1419 = vrcp.f32 %v763_v59 }
 0x50a   :  { %v1420_v61 = vpop.eup %1419 }
 0x50b   :  { %v767_v63 = vmul.f32 %v1420_v61, %v766_v60 }
 0x50d   :  { %v771_v1 = vadd.f32 %v769_v62, %v767_v63 }
 0x50f   :  { %1421 = vtanh.f32 %v771_v1 }
 0x519   :  { %v1422_v2 = vpop.eup %1421 }
 0x51a   :  { %v773_v3 = vsub.f32 %v708_v48, %v1422_v2 }
 0x51c   :  { %775 = vrot.lane.b32.xlu0 %v773_v3, %s1533_s28 }
 0x58e   :  { %v776_v4 = vpop.permute.xlu0 %775 }
 0x58f   :  { %v778_v6 = vmul.f32 %v1420_v61, %v776_v4  ;;  %v938_v61 = vld [vmem:[#allocation2 + $0xa] sm:$0x3] }
 0x590   :  { %v939_v62 = vunpack.c.l.bf16 %v938_v61  ;;  %v1165_v61 = vld [vmem:[%s1893_s5 + $0x18] sm:$0xff] }
 0x591   :  { %780 = vrot.lane.b32.xlu1 %v778_v6, %s1533_s28 }
 0x603   :  { %v781_v7 = vpop.permute.xlu1 %780 }
 0x604   :  { %v783_v8 = vadd.f32 %v1422_v2, %v781_v7 }
 0x606   :  { %v784_v10 = vpack.c.bf16 %v783_v8, %v783_v8 }
 0x608   :  { %786 = vst.msk [vmem:[#allocation6 + $0x2] sm:$0x1] %vm635_vm4, %v784_v10  ;;  %1315 = vmatmul.mubr.msk.bf16.vlgmr.msra.gmra.mrb[8].mxu0 %vm170_vm0, %v784_v10 }
 0x609   :  { %944 = vmatpush1.bf16.msra.mxu0 %v1654_v29  ;;  %975 = vmatprep.mubr.bf16.mxu0 %v1530_v0 }
 0x60a   :  { %945 = vmatprep.subr.bf16.mxu0 %v1659_v32 }
 0x60d   :  { %946 = vmatpush1.bf16.msra.mxu0 %v1665_v35 }
 0x60e   :  { %947 = vmatprep.subr.bf16.mxu0 %v1668_v37 }
 0x611   :  { %948 = vmatpush1.bf16.msra.mxu0 %v1673_v40 }
 0x612   :  { %949 = vmatprep.subr.bf16.mxu0 %v1676_v42 }
 0x615   :  { %950 = vmatpush1.bf16.msra.mxu0 %v1681_v43 }
 0x616   :  { %1093 = vmatprep.subr.bf16.mxu0 %v1651_v27 }
 0x6db   :  { %v827_v14 = vpop.f32.mrb[8].mxu0 }
 0x6dc   :  { %v834_v15 = vadd.f32 %v827_v14, %v789_v13  ;;  %v829_v16 = vpop.f32.mrb[9].mxu0 }
 0x6dd   :  { %v831_v9 = vpop.f32.mrb[10].mxu0  ;;  %v841_v5 = vadd.f32 %v1752_v11, %v829_v16 }
 0x6de   :  { %v1316_v17 = vmul.f32 -1.442695, %v834_v15  ;;  %v832_v18 = vpop.f32.mrb[11].mxu0  ;;  %v1013_v15 = vld [vmem:[#allocation2 + $0xc] sm:$0x3] }
 0x6df   :  { %v1014_v16 = vunpack.c.l.bf16 %v1013_v15 }
 0x6e0   :  { %1423 = vpow2.f32 %v1316_v17 }
 0x6ea   :  { %v1424_v19 = vpop.eup %1423 }
 0x6eb   :  { %v838_v20 = vadd.f32 1.0, %v1424_v19 }
 0x6ed   :  { %1425 = vrcp.f32 %v838_v20 }
 0x6f7   :  { %v1426_v21 = vpop.eup %1425 }
 0x6f8   :  { %v842_v23 = vmul.f32 %v1426_v21, %v841_v5 }
 0x6fa   :  { %v846_v24 = vadd.f32 %v844_v22, %v842_v23 }
 0x6fc   :  { %1427 = vtanh.f32 %v846_v24 }
 0x706   :  { %v1428_v27 = vpop.eup %1427 }
 0x707   :  { %v848_v25 = vsub.f32 %v783_v8, %v1428_v27 }
 0x709   :  { %850 = vrot.lane.b32.xlu0 %v848_v25, %s1533_s28 }
 0x77b   :  { %v851_v26 = vpop.permute.xlu0 %850 }
 0x77c   :  { %v853_v28 = vmul.f32 %v1426_v21, %v851_v26 }
 0x77e   :  { %855 = vrot.lane.b32.xlu1 %v853_v28, %s1533_s28 }
 0x7f0   :  { %v856_v30 = vpop.permute.xlu1 %855 }
 0x7f1   :  { %v858_v31 = vadd.f32 %v1428_v27, %v856_v30  ;;  %v1069_v27 = vrot.slane %v1014_v16, 2 }
 0x7f3   :  { %v859_v33 = vpack.c.bf16 %v858_v31, %v858_v31 }
 0x7f5   :  { %861 = vst.msk [vmem:[#allocation6 + $0x3] sm:$0x1] %vm635_vm4, %v859_v33  ;;  %1317 = vmatmul.mubr.msk.bf16.vlgmr.msra.gmra.mrb[8].mxu1 %vm170_vm0, %v859_v33 }
 0x7f6   :  { %1019 = vmatpush1.bf16.msra.mxu1 %v1654_v29  ;;  %1050 = vmatprep.mubr.bf16.mxu1 %v1530_v0 }
 0x7f7   :  { %1020 = vmatprep.subr.bf16.mxu1 %v1659_v32 }
 0x7fa   :  { %1021 = vmatpush1.bf16.msra.mxu1 %v1665_v35 }
 0x7fb   :  { %1022 = vmatprep.subr.bf16.mxu1 %v1668_v37 }
 0x7fe   :  { %1023 = vmatpush1.bf16.msra.mxu1 %v1673_v40 }
 0x7ff   :  { %1024 = vmatprep.subr.bf16.mxu1 %v1676_v42 }
 0x802   :  { %1025 = vmatpush1.bf16.msra.mxu1 %v1681_v43 }
 0x8c8   :  { %v902_v38 = vpop.f32.mrb[8].mxu1 }
 0x8c9   :  { %v909_v39 = vadd.f32 %v902_v38, %v864_v36  ;;  %v904_v41 = vpop.f32.mrb[9].mxu1 }
 0x8ca   :  { %v906_v44 = vpop.f32.mrb[10].mxu1  ;;  %v916_v49 = vadd.f32 %v1752_v11, %v904_v41 }
 0x8cb   :  { %v1318_v45 = vmul.f32 -1.442695, %v909_v39  ;;  %v907_v46 = vpop.f32.mrb[11].mxu1  ;;  %v1088_v39 = vld [vmem:[#allocation2 + $0xe] sm:$0x3] }
 0x8cc   :  { %v1089_v41 = vunpack.c.l.bf16 %v1088_v39 }
 0x8cd   :  { %1429 = vpow2.f32 %v1318_v45 }
 0x8d7   :  { %v1430_v47 = vpop.eup %1429 }
 0x8d8   :  { %v913_v48 = vadd.f32 1.0, %v1430_v47 }
 0x8da   :  { %1431 = vrcp.f32 %v913_v48 }
 0x8e4   :  { %v1432_v50 = vpop.eup %1431 }
 0x8e5   :  { %v917_v52 = vmul.f32 %v1432_v50, %v916_v49 }
 0x8e7   :  { %v921_v53 = vadd.f32 %v919_v51, %v917_v52 }
 0x8e9   :  { %1433 = vtanh.f32 %v921_v53 }
 0x8f3   :  { %v1434_v54 = vpop.eup %1433 }
 0x8f4   :  { %v923_v55 = vsub.f32 %v858_v31, %v1434_v54 }
 0x8f6   :  { %925 = vrot.lane.b32.xlu0 %v923_v55, %s1533_s28 }
 0x968   :  { %v926_v56 = vpop.permute.xlu0 %925 }
 0x969   :  { %v928_v57 = vmul.f32 %v1432_v50, %v926_v56 }
 0x96b   :  { %930 = vrot.lane.b32.xlu1 %v928_v57, %s1533_s28  ;;  %v1162_v57 = vld [vmem:[%s1893_s5] sm:$0xff] }
 0x9dd   :  { %v931_v58 = vpop.permute.xlu1 %930 }
 0x9de   :  { %v933_v59 = vadd.f32 %v1434_v54, %v931_v58  ;;  %v1144_v54 = vrot.slane %v1089_v41, 2  ;;  %v1163_v58 = vld [vmem:[%s1893_s5 + $0x8] sm:$0xff] }
 0x9e0   :  { %v934_v60 = vpack.c.bf16 %v933_v59, %v933_v59 }
 0x9e2   :  { %936 = vst.msk [vmem:[#allocation6 + $0x4] sm:$0x1] %vm635_vm4, %v934_v60  ;;  %1319 = vmatmul.mubr.msk.bf16.vlgmr.msra.gmra.mrb[12].mxu0 %vm170_vm0, %v934_v60  ;;  %v1534_v60 = vmov 0.0|0.0  }
 0x9e3   :  { %1094 = vmatpush1.bf16.msra.mxu0 %v1654_v29  ;;  %1125 = vmatprep.mubr.bf16.mxu0 %v1530_v0 }
 0x9e4   :  { %1095 = vmatprep.subr.bf16.mxu0 %v1659_v32  ;;  %1355 = vmatprep.subr.bf16.mxu1 %v1534_v60 }
 0x9e7   :  { %1096 = vmatpush1.bf16.msra.mxu0 %v1665_v35 }
 0x9e8   :  { %1097 = vmatprep.subr.bf16.mxu0 %v1668_v37 }
 0x9eb   :  { %1098 = vmatpush1.bf16.msra.mxu0 %v1673_v40  ;;  %v994_v40 = vrot.slane %v939_v62, 2 }
 0x9ec   :  { %1099 = vmatprep.subr.bf16.mxu0 %v1676_v42 }
 0x9ef   :  { %1100 = vmatpush1.bf16.msra.mxu0 %v1681_v43 }
 0xab5   :  { %v977_v63 = vpop.f32.mrb[12].mxu0 }
 0xab6   :  { %v984_v1 = vadd.f32 %v977_v63, %v939_v62  ;;  %v979_v2 = vpop.f32.mrb[13].mxu0  ;;  %v1166_v63 = vld [vmem:[%s1893_s5 + $0x20] sm:$0xff] }
 0xab7   :  { %v981_v29 = vpop.f32.mrb[14].mxu0  ;;  %v991_v35 = vadd.f32 %v1752_v11, %v979_v2 }
 0xab8   :  { %v1320_v3 = vmul.f32 -1.442695, %v984_v1  ;;  %v982_v0 = vpop.f32.mrb[15].mxu0  ;;  %v1167_v1 = vld [vmem:[%s1893_s5 + $0x28] sm:$0xff] }
 0xab9   :  { %v1362_v2 = vpack.c.bf16 %v1167_v1, %v1166_v63  ;;  %v1169_v0 = vld [vmem:[%s1893_s5 + $0x38] sm:$0xff] }
 0xaba   :  { %1435 = vpow2.f32 %v1320_v3  ;;  %v1168_v3 = vld [vmem:[%s1893_s5 + $0x30] sm:$0xff] }
 0xac4   :  { %v1436_v32 = vpop.eup %1435 }
 0xac5   :  { %v988_v4 = vadd.f32 1.0, %v1436_v32 }
 0xac7   :  { %1437 = vrcp.f32 %v988_v4  ;;  %v1365_v4 = vpack.c.bf16 %v1169_v0, %v1168_v3 }
 0xad1   :  { %v1438_v37 = vpop.eup %1437 }
 0xad2   :  { %v992_v6 = vmul.f32 %v1438_v37, %v991_v35  ;;  %v1536_v35 = vmov 0.0  }
 0xad4   :  { %v996_v42 = vadd.f32 %v994_v40, %v992_v6 }
 0xad6   :  { %1439 = vtanh.f32 %v996_v42 }
 0xae0   :  { %v1440_v43 = vpop.eup %1439 }
 0xae1   :  { %v998_v7 = vsub.f32 %v933_v59, %v1440_v43  ;;  %v1164_v59 = vld [vmem:[%s1893_s5 + $0x10] sm:$0xff]  ;;  %s1537_s5 = smov [#allocation6]  }
 0xae2   :  { %v1359_v62 = vpack.c.bf16 %v1165_v61, %v1164_v59  ;;  %s1258_s22 = sshll.u32 %s1537_s5, 4  ;;  %s1259_s22 = int_to_ptr.vmem [resolvable:$true] %s1258_s22 }
 0xae3   :  { %1000 = vrot.lane.b32.xlu0 %v998_v7, %s1533_s28  ;;  %s1477_s3 = scalar_lea.vmem %s1259_s22, 128  ;;  %p1482_p9 = scmp.lt.s32.totalorder %s1259_s22, %s1259_s22 }
 0xae4   :  { %p1478_p8 = scmp.ne.s32.totalorder %s1259_s22, %s1477_s3  ;;  %p1483_p10 = scmp.lt.s32.totalorder %s1477_s3, %s1477_s3 }
 0xae6   :  { %p1484_p11 = por %p1483_p10, %p1482_p9 }
 0xae8   :  { %p1485_p12 = pnand %p1484_p11, %p1478_p8 }
 0xb55   :  { %v1001_v8 = vpop.permute.xlu0 %1000 }
 0xb56   :  { %v1003_v10 = vmul.f32 %v1438_v37, %v1001_v8 }
 0xb58   :  { %1005 = vrot.lane.b32.xlu1 %v1003_v10, %s1533_s28 }
 0xbca   :  { %v1006_v12 = vpop.permute.xlu1 %1005 }
 0xbcb   :  { %v1008_v13 = vadd.f32 %v1440_v43, %v1006_v12 }
 0xbcd   :  { %v1009_v14 = vpack.c.bf16 %v1008_v13, %v1008_v13 }
 0xbcf   :  { %1011 = vst.msk [vmem:[#allocation6 + $0x5] sm:$0x1] %vm635_vm4, %v1009_v14  ;;  %1321 = vmatmul.mubr.msk.bf16.vlgmr.msra.gmra.mrb[12].mxu1 %vm170_vm0, %v1009_v14 }
 0xbd0   :  { %1352 = vmatprep.mubr.msk.f32.mxu1 %vm1535_vm5, %v1536_v35 }
 0xca2   :  { %v1052_v9 = vpop.f32.mrb[12].mxu1 }
 0xca3   :  { %v1059_v17 = vadd.f32 %v1052_v9, %v1014_v16  ;;  %v1054_v18 = vpop.f32.mrb[13].mxu1 }
 0xca4   :  { %v1056_v19 = vpop.f32.mrb[14].mxu1  ;;  %v1066_v23 = vadd.f32 %v1752_v11, %v1054_v18 }
 0xca5   :  { %v1322_v20 = vmul.f32 -1.442695, %v1059_v17  ;;  %v1057_v5 = vpop.f32.mrb[15].mxu1 }
 0xca7   :  { %1441 = vpow2.f32 %v1322_v20 }
 0xcb1   :  { %v1442_v21 = vpop.eup %1441 }
 0xcb2   :  { %v1063_v22 = vadd.f32 1.0, %v1442_v21 }
 0xcb4   :  { %1443 = vrcp.f32 %v1063_v22 }
 0xcbe   :  { %v1444_v24 = vpop.eup %1443 }
 0xcbf   :  { %v1067_v25 = vmul.f32 %v1444_v24, %v1066_v23 }
 0xcc1   :  { %v1071_v26 = vadd.f32 %v1069_v27, %v1067_v25 }
 0xcc3   :  { %1445 = vtanh.f32 %v1071_v26 }
 0xccd   :  { %v1446_v28 = vpop.eup %1445 }
 0xcce   :  { %v1073_v30 = vsub.f32 %v1008_v13, %v1446_v28 }
 0xcd0   :  { %1075 = vrot.lane.b32.xlu0 %v1073_v30, %s1533_s28 }
 0xd42   :  { %v1076_v31 = vpop.permute.xlu0 %1075 }
 0xd43   :  { %v1078_v33 = vmul.f32 %v1444_v24, %v1076_v31 }
 0xd45   :  { %1080 = vrot.lane.b32.xlu1 %v1078_v33, %s1533_s28 }
 0xdb7   :  { %v1081_v34 = vpop.permute.xlu1 %1080 }
 0xdb8   :  { %v1083_v36 = vadd.f32 %v1446_v28, %v1081_v34 }
 0xdba   :  { %v1084_v38 = vpack.c.bf16 %v1083_v36, %v1083_v36 }
 0xdbc   :  { %1086 = vst.msk [vmem:[#allocation6 + $0x6] sm:$0x1] %vm635_vm4, %v1084_v38  ;;  %1323 = vmatmul.mubr.msk.bf16.vlgmr.msra.gmra.mrb[16].mxu0 %vm170_vm0, %v1084_v38 }
 0xe8f   :  { %v1127_v44 = vpop.f32.mrb[16].mxu0 }
 0xe90   :  { %v1134_v45 = vadd.f32 %v1127_v44, %v1089_v41  ;;  %v1129_v46 = vpop.f32.mrb[17].mxu0 }
 0xe91   :  { %v1131_v47 = vpop.f32.mrb[18].mxu0  ;;  %v1141_v52 = vadd.f32 %v1752_v11, %v1129_v46  ;;  %v1356_v11 = vpack.c.bf16 %v1163_v58, %v1162_v57 }
 0xe92   :  { %v1324_v48 = vmul.f32 -1.442695, %v1134_v45  ;;  %v1132_v49 = vpop.f32.mrb[19].mxu0 }
 0xe93   :  { %1357 = vmatpush3.bf16.msra.mxu1 %v1356_v11 }
 0xe94   :  { %1447 = vpow2.f32 %v1324_v48  ;;  %1358 = vmatprep.subr.bf16.mxu1 %v1534_v60 }
 0xe97   :  { %1360 = vmatpush3.bf16.msra.mxu1 %v1359_v62 }
 0xe98   :  { %1361 = vmatprep.subr.bf16.mxu1 %v1534_v60 }
 0xe9b   :  { %1363 = vmatpush3.bf16.msra.mxu1 %v1362_v2 }
 0xe9c   :  { %1364 = vmatprep.subr.bf16.mxu1 %v1534_v60 }
 0xe9e   :  { %v1448_v50 = vpop.eup %1447 }
 0xe9f   :  { %v1138_v51 = vadd.f32 1.0, %v1448_v50  ;;  %1366 = vmatpush3.bf16.msra.mxu1 %v1365_v4 }
 0xea1   :  { %1449 = vrcp.f32 %v1138_v51 }
 0xeab   :  { %v1450_v53 = vpop.eup %1449 }
 0xeac   :  { %v1142_v55 = vmul.f32 %v1450_v53, %v1141_v52 }
 0xeae   :  { %v1146_v56 = vadd.f32 %v1144_v54, %v1142_v55 }
 0xeb0   :  { %1451 = vtanh.f32 %v1146_v56 }
 0xeba   :  { %v1452_v29 = vpop.eup %1451 }
 0xebb   :  { %v1148_v32 = vsub.f32 %v1083_v36, %v1452_v29 }
 0xebd   :  { %1150 = vrot.lane.b32.xlu0 %v1148_v32, %s1533_s28 }
 0xf2f   :  { %v1151_v37 = vpop.permute.xlu0 %1150 }
 0xf30   :  { %v1153_v40 = vmul.f32 %v1450_v53, %v1151_v37 }
 0xf32   :  { %1155 = vrot.lane.b32.xlu1 %v1153_v40, %s1533_s28 }
 0xfa4   :  { %v1156_v6 = vpop.permute.xlu1 %1155 }
 0xfa5   :  { %v1158_v42 = vadd.f32 %v1452_v29, %v1156_v6 }
 0xfa7   :  { %v1159_v43 = vpack.c.bf16 %v1158_v42, %v1158_v42  ;;  %1353 = vmatmul.mubr.msk.f32.vlgmr.msra.gmra.mrb[16].mxu1 %vm170_vm0, %v1158_v42 }
 0xfa9   :  { %1161 = vst.msk [vmem:[#allocation6 + $0x7] sm:$0x1] %vm635_vm4, %v1159_v43 }
 0xfaa   :  { %1488 = shalt.err (!%p1485_p12)
}
 0xfab   :  { %s1489_s0 = scalar_lea.hbm %s1895_s7, 128 }
 0xfac   :  { %p1490_p13 = scmp.ne.s32.totalorder %s1895_s7, %s1489_s0  ;;  %p1493_p0 = scmp.lt.u32.totalorder %s1489_s0, %s1895_s7 }
 0xfae   :  { %p1495_p1 = pnand %p1493_p0, %p1490_p13 }
 0xfb0   :  { %1498 = shalt.err (!%p1495_p1)
}
 0xfb1   :  { %s1538_s27 = smov 16   ;;  %s1539_s28 = smov 1   ;;  %v1325_v7 = vld [vmem:[%s1894_s6] ss:$0 sm:$0xff]  ;;  %vm1251_vm6 = vcmask 254976  }
 0xfb2   :  { %1264 = dma.vmem_to_hbm [thread:$0]  %s1259_s22, 128, %s1895_s7, [#allocation5], %s1538_s27, %s1538_s27, %s1539_s28  }
 0xfb3   :  { %s1540_s10 = smov [#allocation7]  }
 0xfb4   :  { %s1271_s11 = sshll.u32 %s1540_s10, 4  ;;  %s1272_s11 = int_to_ptr.vmem [resolvable:$true] %s1271_s11 }
 0xfb5   :  { %s1499_s12 = scalar_lea.vmem %s1272_s11, 32  ;;  %p1504_p3 = scmp.lt.s32.totalorder %s1272_s11, %s1272_s11 }
 0xfb6   :  { %p1500_p2 = scmp.ne.s32.totalorder %s1272_s11, %s1499_s12  ;;  %p1505_p4 = scmp.lt.s32.totalorder %s1499_s12, %s1499_s12 }
 0xfb8   :  { %p1506_p5 = por %p1505_p4, %p1504_p3 }
 0xfba   :  { %p1507_p6 = pnand %p1506_p5, %p1500_p2 }
0x107a   :  { %v1246_v8 = vpop.f32.mrb[16].mxu1 }
0x107b   :  { %v1247_v10 = vadd.f32 %v1325_v7, %v1246_v8  ;;  %v1354_v12 = vpop.f32.mrb[17].mxu1 }
0x107d   :  { %1453 = vtanh.f32 %v1247_v10 }
0x1087   :  { %v1454_v13 = vpop.eup %1453 }
0x1088   :  { %1252 = vst.msk [vmem:[#allocation7] sm:$0x3] %vm1251_vm6, %v1454_v13 }
0x1089   :  { %1510 = shalt.err (!%p1507_p6)
}
0x108a   :  { %s1511_s6 = scalar_lea.hbm %s1896_s8, 32 }
0x108b   :  { %p1512_p7 = scmp.ne.s32.totalorder %s1896_s8, %s1511_s6  ;;  %p1515_p8 = scmp.lt.u32.totalorder %s1511_s6, %s1896_s8 }
0x108d   :  { %p1517_p9 = pnand %p1515_p8, %p1512_p7 }
0x108f   :  { %1520 = shalt.err (!%p1517_p9)
}
0x1090   :  { %1274 = dma.vmem_to_hbm [thread:$0]  %s1272_s11, 32, %s1896_s8, [#allocation8]  }
0x1091   :  { %1523 = dma.done.wait [#allocation5], 128  }
0x1092   :  { %1524 = vsyncadd [#allocation5], 4294967168 }
0x1093   :  { %1525 = dma.done.wait [#allocation8], 32  }
0x1094   :  { %1526 = vsyncadd [#allocation8], 4294967264 }
0x1095   :  { %1281 = vsyncpa [#allocation4], 1 }
0x1096   :  { %1282 = vsyncpa [#allocation5], 1 }
0x1097   :  { %1283 = vsyncpa [#allocation8], 1 }

</bundles_post_ra>
